<compile_context>
chip_gen: v6e
topology: v6e:2x2x1
jax: 0.10.0
libtpu: 0.0.40
codegen_flags: <defaults>
</compile_context>

<pallas_src>
import functools

import jax
import jax.numpy as jnp
import numpy as np
from jax.experimental import pallas as pl
from jax.experimental.pallas import tpu as pltpu


def _mfa_kernel(xp_ref, toep_ref, scale_ref, shift_ref, pool_ref, wfc_ref, bfc_ref,
                o_ref, *, H, K, block_n):
    """Processes `block_n` images per grid step.

    xp_ref    : (block_n, H+K-1, (W+K-1)*Cin)  bf16  zero-padded input, (W,Cin) flattened
    toep_ref  : (K, (W+K-1)*Cin, W*C4)         bf16  block-Toeplitz combined conv weight
    scale_ref : (1, W*C4)                      f32   folded BN scale (tiled over W)
    shift_ref : (1, W*C4)                      f32   folded BN shift + conv bias (tiled)
    pool_ref  : (W*C4, C4)                     f32   GAP-over-W matrix, includes 1/(H*W)
    wfc_ref   : (C4, Cout)                     f32   FC weight (already transposed)
    bfc_ref   : (1, Cout)                      f32   FC bias
    o_ref     : (1, block_n, Cout)
    """
    wc4 = toep_ref.shape[-1]

    pooled_rows = []
    for b in range(block_n):                       # static unroll over images in the block
        # --- combined conv: K deep matmuls, contraction depth (W+K-1)*Cin ---
        # NOTE: acc is H*W*C4*4 bytes (32 KB here, 8 vregs) and is consumed right away;
        # for much larger H*W*C4 it should move to a pltpu.VMEM scratch accumulator.
        acc = jnp.zeros((H, wc4), jnp.float32)
        for kh in range(K):
            lhs = xp_ref[b, kh:kh + H, :]          # contiguous (H, (W+K-1)*Cin) row slab
            acc = acc + jnp.dot(lhs, toep_ref[kh],
                                preferred_element_type=jnp.float32)

        # --- BatchNorm (eval mode; conv bias folded into shift) + ReLU ---
        y = jnp.maximum(acc * scale_ref[...] + shift_ref[...], 0.0)    # (H, W*C4)

        # --- partial GAP: sum over the H rows (lane-dense reduce) ---
        pooled_rows.append(jnp.sum(y, axis=0, keepdims=True))          # (1, W*C4)

    pooled = jnp.concatenate(pooled_rows, axis=0)                      # (block_n, W*C4)
    # --- GAP over W (and /(H*W)) as an MXU matmul, then the FC ---
    m = jnp.dot(pooled, pool_ref[...], preferred_element_type=jnp.float32)   # (bn, C4)
    out = jnp.dot(m, wfc_ref[...], preferred_element_type=jnp.float32) + bfc_ref[...]
    o_ref[0] = out.astype(o_ref.dtype)


def _build_toeplitz(w_all, W):
    """(K, K, Cin, C4) HWIO conv weight -> (K, (W+K-1)*Cin, W*C4) block-Toeplitz weight.

    toep[kh, (w+kw)*Cin + c, w*C4 + o] = w_all[kh, kw, c, o], zero elsewhere.
    """
    K, _, Cin, C4 = w_all.shape
    w_r = w_all.reshape(K, K * Cin, C4)                    # rows indexed by kw*Cin + c
    cols = [jnp.pad(w_r, ((0, 0), (w * Cin, (W - 1 - w) * Cin), (0, 0)))
            for w in range(W)]
    return jnp.concatenate(cols, axis=-1)                  # (K, (W+K-1)*Cin, W*C4)


def lightweight_mfa(x_nhwc, w_all, b_all, bn_gamma, bn_beta, bn_mean, bn_var,
                    fc_w, fc_b, *, eps=1e-5, block_n=2):
    """x_nhwc: (N, H, W, Cin) f32.  Returns (N, Cout)."""
    N, H, W, Cin = x_nhwc.shape
    K = w_all.shape[0]
    P = K // 2
    C4 = w_all.shape[-1]
    Cout = fc_w.shape[0]
    Hp, Wp = H + 2 * P, W + 2 * P

    # Pad the batch up to a multiple of block_n (extra rows sliced off at the end).
    n_pad = (-N) % block_n
    if n_pad:
        x_nhwc = jnp.pad(x_nhwc, ((0, n_pad), (0, 0), (0, 0), (0, 0)))
    Nb = N + n_pad

    # Glue: halo pad (cheap one-off at these sizes), flatten (W, Cin) into the lane dim,
    # cast to bf16 (half the input DMA, native MXU operand).
    xp = jnp.pad(x_nhwc, ((0, 0), (P, P), (P, P), (0, 0)))
    xp = xp.reshape(Nb, Hp, Wp * Cin).astype(jnp.bfloat16)

    # Block-Toeplitz conv weight (bf16 MXU operand, resident in VMEM across grid steps).
    toep = _build_toeplitz(w_all, W).astype(jnp.bfloat16)          # (K, Wp*Cin, W*C4)

    # Eval-mode BN folded into scale/shift; conv bias folded into the shift.
    scale = bn_gamma / jnp.sqrt(bn_var + eps)
    shift = bn_beta - bn_mean * scale + b_all * scale
    scale_t = jnp.tile(scale, W).reshape(1, W * C4).astype(jnp.float32)
    shift_t = jnp.tile(shift, W).reshape(1, W * C4).astype(jnp.float32)

    # GAP-over-W pooling matrix (includes the 1/(H*W) normalisation).
    pool = jnp.tile(jnp.eye(C4, dtype=jnp.float32), (W, 1)) / float(H * W)

    kernel = functools.partial(_mfa_kernel, H=H, K=K, block_n=block_n)

    out = pl.pallas_call(
        kernel,
        out_shape=jax.ShapeDtypeStruct((Nb // block_n, block_n, Cout), x_nhwc.dtype),
        grid_spec=pltpu.PrefetchScalarGridSpec(
            num_scalar_prefetch=0,
            grid=(Nb // block_n,),
            in_specs=[
                pl.BlockSpec((block_n, Hp, Wp * Cin), lambda n: (n, 0, 0)),
                pl.BlockSpec((K, Wp * Cin, W * C4), lambda n: (0, 0, 0)),
                pl.BlockSpec((1, W * C4), lambda n: (0, 0)),
                pl.BlockSpec((1, W * C4), lambda n: (0, 0)),
                pl.BlockSpec((W * C4, C4), lambda n: (0, 0)),
                pl.BlockSpec((C4, Cout), lambda n: (0, 0)),
                pl.BlockSpec((1, Cout), lambda n: (0, 0)),
            ],
            out_specs=pl.BlockSpec((1, block_n, Cout), lambda n: (n, 0, 0)),
        ),
        compiler_params=pltpu.CompilerParams(
            dimension_semantics=("parallel",),        # batch blocks are independent (2 TCs on v7x)
            vmem_limit_bytes=32 * 1024 * 1024,        # raise v5e's 16 MiB scoped default; safe on v6e/v7x
        ),
    )(xp, toep, scale_t, shift_t, pool,
      fc_w.T.astype(jnp.float32), fc_b.reshape(1, Cout).astype(jnp.float32))

    return out.reshape(Nb, Cout)[:N]


def _reference(x_nhwc, convs, bn_gamma, bn_beta, bn_mean, bn_var, fc_w, fc_b, eps=1e-5):
    """Pure-JAX reference (same eval-mode BN semantics), full f32 precision."""
    def conv(x, w, pad):
        return jax.lax.conv_general_dilated(
            x, w, window_strides=(1, 1), padding=((pad, pad), (pad, pad)),
            dimension_numbers=("NHWC", "HWIO", "NHWC"),
            precision=jax.lax.Precision.HIGHEST)
    ys = [conv(x_nhwc, w, w.shape[0] // 2) + b for (w, b) in convs]
    y = jnp.concatenate(ys, axis=-1)
    y = (y - bn_mean) / jnp.sqrt(bn_var + eps) * bn_gamma + bn_beta
    y = jax.nn.relu(y)
    y = jnp.mean(y, axis=(1, 2))
    return y @ fc_w.T + fc_b


if __name__ == "__main__":
    N, Cin, Cout, H, W = 4, 4, 8, 16, 16
    C4 = 4 * Cout

    key = jax.random.PRNGKey(0)
    ks = jax.random.split(key, 16)

    # Input follows PyTorch NCHW convention; transpose to NHWC for the kernel.
    x_nchw = jax.random.normal(ks[0], (N, Cin, H, W), jnp.float32)
    x_nhwc = jnp.transpose(x_nchw, (0, 2, 3, 1))

    # Deterministic synthetic parameters (HWIO conv weights).
    w1 = 0.1 * jax.random.normal(ks[1], (1, 1, Cin, Cout), jnp.float32)
    b1 = 0.1 * jax.random.normal(ks[2], (Cout,), jnp.float32)
    w2 = 0.1 * jax.random.normal(ks[3], (3, 3, Cin, Cout), jnp.float32)
    b2 = 0.1 * jax.random.normal(ks[4], (Cout,), jnp.float32)
    w3 = 0.1 * jax.random.normal(ks[5], (5, 5, Cin, Cout), jnp.float32)
    b3 = 0.1 * jax.random.normal(ks[6], (Cout,), jnp.float32)
    w4 = 0.1 * jax.random.normal(ks[7], (7, 7, Cin, Cout), jnp.float32)
    b4 = 0.1 * jax.random.normal(ks[8], (Cout,), jnp.float32)

    bn_gamma = 1.0 + 0.1 * jax.random.normal(ks[9], (C4,), jnp.float32)
    bn_beta = 0.1 * jax.random.normal(ks[10], (C4,), jnp.float32)
    bn_mean = 0.1 * jax.random.normal(ks[11], (C4,), jnp.float32)
    bn_var = 0.5 + jax.random.uniform(ks[12], (C4,), jnp.float32)

    fc_w = 0.1 * jax.random.normal(ks[13], (Cout, C4), jnp.float32)   # PyTorch (out, in)
    fc_b = 0.1 * jax.random.normal(ks[14], (Cout,), jnp.float32)

    # Fold the four convs into a single zero-padded 7x7 conv producing the
    # channel-concatenated output [conv1 | conv2 | conv3 | conv4].
    w_all = jnp.zeros((7, 7, Cin, C4), jnp.float32)
    w_all = w_all.at[3:4, 3:4, :, 0 * Cout:1 * Cout].set(w1)
    w_all = w_all.at[2:5, 2:5, :, 1 * Cout:2 * Cout].set(w2)
    w_all = w_all.at[1:6, 1:6, :, 2 * Cout:3 * Cout].set(w3)
    w_all = w_all.at[0:7, 0:7, :, 3 * Cout:4 * Cout].set(w4)
    b_all = jnp.concatenate([b1, b2, b3, b4])

    out = lightweight_mfa(x_nhwc, w_all, b_all, bn_gamma, bn_beta, bn_mean, bn_var,
                          fc_w, fc_b, block_n=2)
    jax.block_until_ready(out)

    ref = _reference(x_nhwc, [(w1, b1), (w2, b2), (w3, b3), (w4, b4)],
                     bn_gamma, bn_beta, bn_mean, bn_var, fc_w, fc_b)

    # Tolerance loosened vs the f32 version: the conv matmul now uses bf16 operands
    # (f32 accumulation), per the perf review; the reference is full-f32 HIGHEST.
    np.testing.assert_allclose(np.asarray(out), np.asarray(ref), rtol=2e-2, atol=2e-2)

    print("KERNEL_OK")
</pallas_src>

<mosaic_0001>
module attributes {stable_mosaic.version = 11 : i64} {
  func.func @_mfa_kernel(%arg0: i32, %arg1: memref<2x22x88xbf16, #tpu.memory_space<vmem>>, %arg2: memref<7x88x512xbf16, #tpu.memory_space<vmem>>, %arg3: memref<1x512xf32, #tpu.memory_space<vmem>>, %arg4: memref<1x512xf32, #tpu.memory_space<vmem>>, %arg5: memref<512x32xf32, #tpu.memory_space<vmem>>, %arg6: memref<32x8xf32, #tpu.memory_space<vmem>>, %arg7: memref<1x8xf32, #tpu.memory_space<vmem>>, %arg8: memref<1x2x8xf32, #tpu.memory_space<vmem>>) attributes {dimension_semantics = [#tpu.dimension_semantics<parallel>], iteration_bounds = array<i64: 2>, scalar_prefetch = 0 : i64, scratch_operands = 0 : i64, tpu.core_type = #tpu.core_type<tc>, window_params = [{transform_indices = @transform_0, window_bounds = array<i64: 2, 22, 88>}, {pipeline_mode = #tpu.pipeline_mode<synchronous>, transform_indices = @transform_1, window_bounds = array<i64: 7, 88, 512>}, {pipeline_mode = #tpu.pipeline_mode<synchronous>, transform_indices = @transform_2, window_bounds = array<i64: 1, 512>}, {pipeline_mode = #tpu.pipeline_mode<synchronous>, transform_indices = @transform_3, window_bounds = array<i64: 1, 512>}, {pipeline_mode = #tpu.pipeline_mode<synchronous>, transform_indices = @transform_4, window_bounds = array<i64: 512, 32>}, {pipeline_mode = #tpu.pipeline_mode<synchronous>, transform_indices = @transform_5, window_bounds = array<i64: 32, 8>}, {pipeline_mode = #tpu.pipeline_mode<synchronous>, transform_indices = @transform_6, window_bounds = array<i64: 1, 8>}, {transform_indices = @transform_7, window_bounds = array<i64: 1, 2, 8>}]} {
    %cst = arith.constant 0.000000e+00 : f32
    %0 = vector.broadcast %cst : f32 to vector<16x512xf32>
    %c0 = arith.constant 0 : index
    %c0_0 = arith.constant 0 : index
    %c0_1 = arith.constant 0 : index
    %1 = vector.load %arg1[%c0, %c0_0, %c0_1] : memref<2x22x88xbf16, #tpu.memory_space<vmem>>, vector<1x16x88xbf16>
    %2 = vector.shape_cast %1 : vector<1x16x88xbf16> to vector<16x88xbf16>
    %c0_2 = arith.constant 0 : index
    %c0_3 = arith.constant 0 : index
    %c0_4 = arith.constant 0 : index
    %3 = vector.load %arg2[%c0_2, %c0_3, %c0_4] : memref<7x88x512xbf16, #tpu.memory_space<vmem>>, vector<1x88x512xbf16>
    %4 = vector.shape_cast %3 : vector<1x88x512xbf16> to vector<88x512xbf16>
    %cst_5 = arith.constant dense<0.000000e+00> : vector<16x512xf32>
    %5 = tpu.matmul %2, %4, %cst_5 {dimension_numbers = #tpu.dot_dimension_numbers<[1], [0], [0], [1], [0, 0, 1, 1], [], []>} : vector<16x88xbf16>, vector<88x512xbf16>, vector<16x512xf32> -> vector<16x512xf32>
    %6 = arith.addf %0, %5 : vector<16x512xf32>
    %c0_6 = arith.constant 0 : index
    %c1 = arith.constant 1 : index
    %c0_7 = arith.constant 0 : index
    %7 = vector.load %arg1[%c0_6, %c1, %c0_7] : memref<2x22x88xbf16, #tpu.memory_space<vmem>>, vector<1x16x88xbf16>
    %8 = vector.shape_cast %7 : vector<1x16x88xbf16> to vector<16x88xbf16>
    %c1_8 = arith.constant 1 : index
    %c0_9 = arith.constant 0 : index
    %c0_10 = arith.constant 0 : index
    %9 = vector.load %arg2[%c1_8, %c0_9, %c0_10] : memref<7x88x512xbf16, #tpu.memory_space<vmem>>, vector<1x88x512xbf16>
    %10 = vector.shape_cast %9 : vector<1x88x512xbf16> to vector<88x512xbf16>
    %cst_11 = arith.constant dense<0.000000e+00> : vector<16x512xf32>
    %11 = tpu.matmul %8, %10, %cst_11 {dimension_numbers = #tpu.dot_dimension_numbers<[1], [0], [0], [1], [0, 0, 1, 1], [], []>} : vector<16x88xbf16>, vector<88x512xbf16>, vector<16x512xf32> -> vector<16x512xf32>
    %12 = arith.addf %6, %11 : vector<16x512xf32>
    %c0_12 = arith.constant 0 : index
    %c2 = arith.constant 2 : index
    %c0_13 = arith.constant 0 : index
    %13 = vector.load %arg1[%c0_12, %c2, %c0_13] : memref<2x22x88xbf16, #tpu.memory_space<vmem>>, vector<1x16x88xbf16>
    %14 = vector.shape_cast %13 : vector<1x16x88xbf16> to vector<16x88xbf16>
    %c2_14 = arith.constant 2 : index
    %c0_15 = arith.constant 0 : index
    %c0_16 = arith.constant 0 : index
    %15 = vector.load %arg2[%c2_14, %c0_15, %c0_16] : memref<7x88x512xbf16, #tpu.memory_space<vmem>>, vector<1x88x512xbf16>
    %16 = vector.shape_cast %15 : vector<1x88x512xbf16> to vector<88x512xbf16>
    %cst_17 = arith.constant dense<0.000000e+00> : vector<16x512xf32>
    %17 = tpu.matmul %14, %16, %cst_17 {dimension_numbers = #tpu.dot_dimension_numbers<[1], [0], [0], [1], [0, 0, 1, 1], [], []>} : vector<16x88xbf16>, vector<88x512xbf16>, vector<16x512xf32> -> vector<16x512xf32>
    %18 = arith.addf %12, %17 : vector<16x512xf32>
    %c0_18 = arith.constant 0 : index
    %c3 = arith.constant 3 : index
    %c0_19 = arith.constant 0 : index
    %19 = vector.load %arg1[%c0_18, %c3, %c0_19] : memref<2x22x88xbf16, #tpu.memory_space<vmem>>, vector<1x16x88xbf16>
    %20 = vector.shape_cast %19 : vector<1x16x88xbf16> to vector<16x88xbf16>
    %c3_20 = arith.constant 3 : index
    %c0_21 = arith.constant 0 : index
    %c0_22 = arith.constant 0 : index
    %21 = vector.load %arg2[%c3_20, %c0_21, %c0_22] : memref<7x88x512xbf16, #tpu.memory_space<vmem>>, vector<1x88x512xbf16>
    %22 = vector.shape_cast %21 : vector<1x88x512xbf16> to vector<88x512xbf16>
    %cst_23 = arith.constant dense<0.000000e+00> : vector<16x512xf32>
    %23 = tpu.matmul %20, %22, %cst_23 {dimension_numbers = #tpu.dot_dimension_numbers<[1], [0], [0], [1], [0, 0, 1, 1], [], []>} : vector<16x88xbf16>, vector<88x512xbf16>, vector<16x512xf32> -> vector<16x512xf32>
    %24 = arith.addf %18, %23 : vector<16x512xf32>
    %c0_24 = arith.constant 0 : index
    %c4 = arith.constant 4 : index
    %c0_25 = arith.constant 0 : index
    %25 = vector.load %arg1[%c0_24, %c4, %c0_25] : memref<2x22x88xbf16, #tpu.memory_space<vmem>>, vector<1x16x88xbf16>
    %26 = vector.shape_cast %25 : vector<1x16x88xbf16> to vector<16x88xbf16>
    %c4_26 = arith.constant 4 : index
    %c0_27 = arith.constant 0 : index
    %c0_28 = arith.constant 0 : index
    %27 = vector.load %arg2[%c4_26, %c0_27, %c0_28] : memref<7x88x512xbf16, #tpu.memory_space<vmem>>, vector<1x88x512xbf16>
    %28 = vector.shape_cast %27 : vector<1x88x512xbf16> to vector<88x512xbf16>
    %cst_29 = arith.constant dense<0.000000e+00> : vector<16x512xf32>
    %29 = tpu.matmul %26, %28, %cst_29 {dimension_numbers = #tpu.dot_dimension_numbers<[1], [0], [0], [1], [0, 0, 1, 1], [], []>} : vector<16x88xbf16>, vector<88x512xbf16>, vector<16x512xf32> -> vector<16x512xf32>
    %30 = arith.addf %24, %29 : vector<16x512xf32>
    %c0_30 = arith.constant 0 : index
    %c5 = arith.constant 5 : index
    %c0_31 = arith.constant 0 : index
    %31 = vector.load %arg1[%c0_30, %c5, %c0_31] : memref<2x22x88xbf16, #tpu.memory_space<vmem>>, vector<1x16x88xbf16>
    %32 = vector.shape_cast %31 : vector<1x16x88xbf16> to vector<16x88xbf16>
    %c5_32 = arith.constant 5 : index
    %c0_33 = arith.constant 0 : index
    %c0_34 = arith.constant 0 : index
    %33 = vector.load %arg2[%c5_32, %c0_33, %c0_34] : memref<7x88x512xbf16, #tpu.memory_space<vmem>>, vector<1x88x512xbf16>
    %34 = vector.shape_cast %33 : vector<1x88x512xbf16> to vector<88x512xbf16>
    %cst_35 = arith.constant dense<0.000000e+00> : vector<16x512xf32>
    %35 = tpu.matmul %32, %34, %cst_35 {dimension_numbers = #tpu.dot_dimension_numbers<[1], [0], [0], [1], [0, 0, 1, 1], [], []>} : vector<16x88xbf16>, vector<88x512xbf16>, vector<16x512xf32> -> vector<16x512xf32>
    %36 = arith.addf %30, %35 : vector<16x512xf32>
    %c0_36 = arith.constant 0 : index
    %c6 = arith.constant 6 : index
    %c0_37 = arith.constant 0 : index
    %37 = vector.load %arg1[%c0_36, %c6, %c0_37] : memref<2x22x88xbf16, #tpu.memory_space<vmem>>, vector<1x16x88xbf16>
    %38 = vector.shape_cast %37 : vector<1x16x88xbf16> to vector<16x88xbf16>
    %c6_38 = arith.constant 6 : index
    %c0_39 = arith.constant 0 : index
    %c0_40 = arith.constant 0 : index
    %39 = vector.load %arg2[%c6_38, %c0_39, %c0_40] : memref<7x88x512xbf16, #tpu.memory_space<vmem>>, vector<1x88x512xbf16>
    %40 = vector.shape_cast %39 : vector<1x88x512xbf16> to vector<88x512xbf16>
    %cst_41 = arith.constant dense<0.000000e+00> : vector<16x512xf32>
    %41 = tpu.matmul %38, %40, %cst_41 {dimension_numbers = #tpu.dot_dimension_numbers<[1], [0], [0], [1], [0, 0, 1, 1], [], []>} : vector<16x88xbf16>, vector<88x512xbf16>, vector<16x512xf32> -> vector<16x512xf32>
    %42 = arith.addf %36, %41 : vector<16x512xf32>
    %c0_42 = arith.constant 0 : index
    %c0_43 = arith.constant 0 : index
    %43 = vector.load %arg3[%c0_42, %c0_43] : memref<1x512xf32, #tpu.memory_space<vmem>>, vector<1x512xf32>
    %44 = vector.broadcast %43 : vector<1x512xf32> to vector<16x512xf32>
    %45 = arith.mulf %42, %44 : vector<16x512xf32>
    %c0_44 = arith.constant 0 : index
    %c0_45 = arith.constant 0 : index
    %46 = vector.load %arg4[%c0_44, %c0_45] : memref<1x512xf32, #tpu.memory_space<vmem>>, vector<1x512xf32>
    %47 = vector.broadcast %46 : vector<1x512xf32> to vector<16x512xf32>
    %48 = arith.addf %45, %47 : vector<16x512xf32>
    %cst_46 = arith.constant 0.000000e+00 : f32
    %49 = vector.broadcast %cst_46 : f32 to vector<16x512xf32>
    %50 = arith.maximumf %48, %49 : vector<16x512xf32>
    %cst_47 = arith.constant dense<0.000000e+00> : vector<512xf32>
    %51 = vector.multi_reduction <add>, %50, %cst_47 [0] : vector<16x512xf32> to vector<512xf32>
    %52 = vector.shape_cast %51 : vector<512xf32> to vector<1x512xf32>
    %cst_48 = arith.constant 0.000000e+00 : f32
    %53 = vector.broadcast %cst_48 : f32 to vector<16x512xf32>
    %c1_49 = arith.constant 1 : index
    %c0_50 = arith.constant 0 : index
    %c0_51 = arith.constant 0 : index
    %54 = vector.load %arg1[%c1_49, %c0_50, %c0_51] : memref<2x22x88xbf16, #tpu.memory_space<vmem>>, vector<1x16x88xbf16>
    %55 = vector.shape_cast %54 : vector<1x16x88xbf16> to vector<16x88xbf16>
    %c0_52 = arith.constant 0 : index
    %c0_53 = arith.constant 0 : index
    %c0_54 = arith.constant 0 : index
    %56 = vector.load %arg2[%c0_52, %c0_53, %c0_54] : memref<7x88x512xbf16, #tpu.memory_space<vmem>>, vector<1x88x512xbf16>
    %57 = vector.shape_cast %56 : vector<1x88x512xbf16> to vector<88x512xbf16>
    %cst_55 = arith.constant dense<0.000000e+00> : vector<16x512xf32>
    %58 = tpu.matmul %55, %57, %cst_55 {dimension_numbers = #tpu.dot_dimension_numbers<[1], [0], [0], [1], [0, 0, 1, 1], [], []>} : vector<16x88xbf16>, vector<88x512xbf16>, vector<16x512xf32> -> vector<16x512xf32>
    %59 = arith.addf %53, %58 : vector<16x512xf32>
    %c1_56 = arith.constant 1 : index
    %c1_57 = arith.constant 1 : index
    %c0_58 = arith.constant 0 : index
    %60 = vector.load %arg1[%c1_56, %c1_57, %c0_58] : memref<2x22x88xbf16, #tpu.memory_space<vmem>>, vector<1x16x88xbf16>
    %61 = vector.shape_cast %60 : vector<1x16x88xbf16> to vector<16x88xbf16>
    %c1_59 = arith.constant 1 : index
    %c0_60 = arith.constant 0 : index
    %c0_61 = arith.constant 0 : index
    %62 = vector.load %arg2[%c1_59, %c0_60, %c0_61] : memref<7x88x512xbf16, #tpu.memory_space<vmem>>, vector<1x88x512xbf16>
    %63 = vector.shape_cast %62 : vector<1x88x512xbf16> to vector<88x512xbf16>
    %cst_62 = arith.constant dense<0.000000e+00> : vector<16x512xf32>
    %64 = tpu.matmul %61, %63, %cst_62 {dimension_numbers = #tpu.dot_dimension_numbers<[1], [0], [0], [1], [0, 0, 1, 1], [], []>} : vector<16x88xbf16>, vector<88x512xbf16>, vector<16x512xf32> -> vector<16x512xf32>
    %65 = arith.addf %59, %64 : vector<16x512xf32>
    %c1_63 = arith.constant 1 : index
    %c2_64 = arith.constant 2 : index
    %c0_65 = arith.constant 0 : index
    %66 = vector.load %arg1[%c1_63, %c2_64, %c0_65] : memref<2x22x88xbf16, #tpu.memory_space<vmem>>, vector<1x16x88xbf16>
    %67 = vector.shape_cast %66 : vector<1x16x88xbf16> to vector<16x88xbf16>
    %c2_66 = arith.constant 2 : index
    %c0_67 = arith.constant 0 : index
    %c0_68 = arith.constant 0 : index
    %68 = vector.load %arg2[%c2_66, %c0_67, %c0_68] : memref<7x88x512xbf16, #tpu.memory_space<vmem>>, vector<1x88x512xbf16>
    %69 = vector.shape_cast %68 : vector<1x88x512xbf16> to vector<88x512xbf16>
    %cst_69 = arith.constant dense<0.000000e+00> : vector<16x512xf32>
    %70 = tpu.matmul %67, %69, %cst_69 {dimension_numbers = #tpu.dot_dimension_numbers<[1], [0], [0], [1], [0, 0, 1, 1], [], []>} : vector<16x88xbf16>, vector<88x512xbf16>, vector<16x512xf32> -> vector<16x512xf32>
    %71 = arith.addf %65, %70 : vector<16x512xf32>
    %c1_70 = arith.constant 1 : index
    %c3_71 = arith.constant 3 : index
    %c0_72 = arith.constant 0 : index
    %72 = vector.load %arg1[%c1_70, %c3_71, %c0_72] : memref<2x22x88xbf16, #tpu.memory_space<vmem>>, vector<1x16x88xbf16>
    %73 = vector.shape_cast %72 : vector<1x16x88xbf16> to vector<16x88xbf16>
    %c3_73 = arith.constant 3 : index
    %c0_74 = arith.constant 0 : index
    %c0_75 = arith.constant 0 : index
    %74 = vector.load %arg2[%c3_73, %c0_74, %c0_75] : memref<7x88x512xbf16, #tpu.memory_space<vmem>>, vector<1x88x512xbf16>
    %75 = vector.shape_cast %74 : vector<1x88x512xbf16> to vector<88x512xbf16>
    %cst_76 = arith.constant dense<0.000000e+00> : vector<16x512xf32>
    %76 = tpu.matmul %73, %75, %cst_76 {dimension_numbers = #tpu.dot_dimension_numbers<[1], [0], [0], [1], [0, 0, 1, 1], [], []>} : vector<16x88xbf16>, vector<88x512xbf16>, vector<16x512xf32> -> vector<16x512xf32>
    %77 = arith.addf %71, %76 : vector<16x512xf32>
    %c1_77 = arith.constant 1 : index
    %c4_78 = arith.constant 4 : index
    %c0_79 = arith.constant 0 : index
    %78 = vector.load %arg1[%c1_77, %c4_78, %c0_79] : memref<2x22x88xbf16, #tpu.memory_space<vmem>>, vector<1x16x88xbf16>
    %79 = vector.shape_cast %78 : vector<1x16x88xbf16> to vector<16x88xbf16>
    %c4_80 = arith.constant 4 : index
    %c0_81 = arith.constant 0 : index
    %c0_82 = arith.constant 0 : index
    %80 = vector.load %arg2[%c4_80, %c0_81, %c0_82] : memref<7x88x512xbf16, #tpu.memory_space<vmem>>, vector<1x88x512xbf16>
    %81 = vector.shape_cast %80 : vector<1x88x512xbf16> to vector<88x512xbf16>
    %cst_83 = arith.constant dense<0.000000e+00> : vector<16x512xf32>
    %82 = tpu.matmul %79, %81, %cst_83 {dimension_numbers = #tpu.dot_dimension_numbers<[1], [0], [0], [1], [0, 0, 1, 1], [], []>} : vector<16x88xbf16>, vector<88x512xbf16>, vector<16x512xf32> -> vector<16x512xf32>
    %83 = arith.addf %77, %82 : vector<16x512xf32>
    %c1_84 = arith.constant 1 : index
    %c5_85 = arith.constant 5 : index
    %c0_86 = arith.constant 0 : index
    %84 = vector.load %arg1[%c1_84, %c5_85, %c0_86] : memref<2x22x88xbf16, #tpu.memory_space<vmem>>, vector<1x16x88xbf16>
    %85 = vector.shape_cast %84 : vector<1x16x88xbf16> to vector<16x88xbf16>
    %c5_87 = arith.constant 5 : index
    %c0_88 = arith.constant 0 : index
    %c0_89 = arith.constant 0 : index
    %86 = vector.load %arg2[%c5_87, %c0_88, %c0_89] : memref<7x88x512xbf16, #tpu.memory_space<vmem>>, vector<1x88x512xbf16>
    %87 = vector.shape_cast %86 : vector<1x88x512xbf16> to vector<88x512xbf16>
    %cst_90 = arith.constant dense<0.000000e+00> : vector<16x512xf32>
    %88 = tpu.matmul %85, %87, %cst_90 {dimension_numbers = #tpu.dot_dimension_numbers<[1], [0], [0], [1], [0, 0, 1, 1], [], []>} : vector<16x88xbf16>, vector<88x512xbf16>, vector<16x512xf32> -> vector<16x512xf32>
    %89 = arith.addf %83, %88 : vector<16x512xf32>
    %c1_91 = arith.constant 1 : index
    %c6_92 = arith.constant 6 : index
    %c0_93 = arith.constant 0 : index
    %90 = vector.load %arg1[%c1_91, %c6_92, %c0_93] : memref<2x22x88xbf16, #tpu.memory_space<vmem>>, vector<1x16x88xbf16>
    %91 = vector.shape_cast %90 : vector<1x16x88xbf16> to vector<16x88xbf16>
    %c6_94 = arith.constant 6 : index
    %c0_95 = arith.constant 0 : index
    %c0_96 = arith.constant 0 : index
    %92 = vector.load %arg2[%c6_94, %c0_95, %c0_96] : memref<7x88x512xbf16, #tpu.memory_space<vmem>>, vector<1x88x512xbf16>
    %93 = vector.shape_cast %92 : vector<1x88x512xbf16> to vector<88x512xbf16>
    %cst_97 = arith.constant dense<0.000000e+00> : vector<16x512xf32>
    %94 = tpu.matmul %91, %93, %cst_97 {dimension_numbers = #tpu.dot_dimension_numbers<[1], [0], [0], [1], [0, 0, 1, 1], [], []>} : vector<16x88xbf16>, vector<88x512xbf16>, vector<16x512xf32> -> vector<16x512xf32>
    %95 = arith.addf %89, %94 : vector<16x512xf32>
    %c0_98 = arith.constant 0 : index
    %c0_99 = arith.constant 0 : index
    %96 = vector.load %arg3[%c0_98, %c0_99] : memref<1x512xf32, #tpu.memory_space<vmem>>, vector<1x512xf32>
    %97 = vector.broadcast %96 : vector<1x512xf32> to vector<16x512xf32>
    %98 = arith.mulf %95, %97 : vector<16x512xf32>
    %c0_100 = arith.constant 0 : index
    %c0_101 = arith.constant 0 : index
    %99 = vector.load %arg4[%c0_100, %c0_101] : memref<1x512xf32, #tpu.memory_space<vmem>>, vector<1x512xf32>
    %100 = vector.broadcast %99 : vector<1x512xf32> to vector<16x512xf32>
    %101 = arith.addf %98, %100 : vector<16x512xf32>
    %cst_102 = arith.constant 0.000000e+00 : f32
    %102 = vector.broadcast %cst_102 : f32 to vector<16x512xf32>
    %103 = arith.maximumf %101, %102 : vector<16x512xf32>
    %cst_103 = arith.constant dense<0.000000e+00> : vector<512xf32>
    %104 = vector.multi_reduction <add>, %103, %cst_103 [0] : vector<16x512xf32> to vector<512xf32>
    %105 = vector.shape_cast %104 : vector<512xf32> to vector<1x512xf32>
    %106 = tpu.concatenate %52, %105 in 0 : vector<1x512xf32>, vector<1x512xf32> -> vector<2x512xf32>
    %c0_104 = arith.constant 0 : index
    %c0_105 = arith.constant 0 : index
    %107 = vector.load %arg5[%c0_104, %c0_105] : memref<512x32xf32, #tpu.memory_space<vmem>>, vector<512x32xf32>
    %cst_106 = arith.constant dense<0.000000e+00> : vector<2x32xf32>
    %108 = tpu.matmul %106, %107, %cst_106 {dimension_numbers = #tpu.dot_dimension_numbers<[1], [0], [0], [1], [0, 0, 1, 1], [], []>} : vector<2x512xf32>, vector<512x32xf32>, vector<2x32xf32> -> vector<2x32xf32>
    %c0_107 = arith.constant 0 : index
    %c0_108 = arith.constant 0 : index
    %109 = vector.load %arg6[%c0_107, %c0_108] : memref<32x8xf32, #tpu.memory_space<vmem>>, vector<32x8xf32>
    %cst_109 = arith.constant dense<0.000000e+00> : vector<2x8xf32>
    %110 = tpu.matmul %108, %109, %cst_109 {dimension_numbers = #tpu.dot_dimension_numbers<[1], [0], [0], [1], [0, 0, 1, 1], [], []>} : vector<2x32xf32>, vector<32x8xf32>, vector<2x8xf32> -> vector<2x8xf32>
    %c0_110 = arith.constant 0 : index
    %c0_111 = arith.constant 0 : index
    %111 = vector.load %arg7[%c0_110, %c0_111] : memref<1x8xf32, #tpu.memory_space<vmem>>, vector<1x8xf32>
    %112 = vector.broadcast %111 : vector<1x8xf32> to vector<2x8xf32>
    %113 = arith.addf %110, %112 : vector<2x8xf32>
    %c0_112 = arith.constant 0 : index
    %c0_113 = arith.constant 0 : index
    %c0_114 = arith.constant 0 : index
    %114 = vector.load %arg8[%c0_112, %c0_113, %c0_114] : memref<1x2x8xf32, #tpu.memory_space<vmem>>, vector<1x2x8xf32>
    %115 = vector.shape_cast %114 : vector<1x2x8xf32> to vector<2x8xf32>
    %116 = vector.shape_cast %113 : vector<2x8xf32> to vector<1x2x8xf32>
    tpu.vector_store %arg8[%c0_112, %c0_113, %c0_114], %116 {strides = array<i32>} : memref<1x2x8xf32, #tpu.memory_space<vmem>>, vector<1x2x8xf32>,
    return
  }
  func.func @transform_0(%arg0: i32) -> (i32, i32, i32) {
    %c0_i32 = arith.constant 0 : i32
    %c0_i32_0 = arith.constant 0 : i32
    %c0_i32_1 = arith.constant 0 : i32
    return %arg0, %c0_i32, %c0_i32_0 : i32, i32, i32
  }
  func.func @transform_1(%arg0: i32) -> (i32, i32, i32) {
    %c0_i32 = arith.constant 0 : i32
    %c0_i32_0 = arith.constant 0 : i32
    %c0_i32_1 = arith.constant 0 : i32
    %c0_i32_2 = arith.constant 0 : i32
    return %c0_i32, %c0_i32_0, %c0_i32_1 : i32, i32, i32
  }
  func.func @transform_2(%arg0: i32) -> (i32, i32) {
    %c0_i32 = arith.constant 0 : i32
    %c0_i32_0 = arith.constant 0 : i32
    %c0_i32_1 = arith.constant 0 : i32
    return %c0_i32, %c0_i32_0 : i32, i32
  }
  func.func @transform_3(%arg0: i32) -> (i32, i32) {
    %c0_i32 = arith.constant 0 : i32
    %c0_i32_0 = arith.constant 0 : i32
    %c0_i32_1 = arith.constant 0 : i32
    return %c0_i32, %c0_i32_0 : i32, i32
  }
  func.func @transform_4(%arg0: i32) -> (i32, i32) {
    %c0_i32 = arith.constant 0 : i32
    %c0_i32_0 = arith.constant 0 : i32
    %c0_i32_1 = arith.constant 0 : i32
    return %c0_i32, %c0_i32_0 : i32, i32
  }
  func.func @transform_5(%arg0: i32) -> (i32, i32) {
    %c0_i32 = arith.constant 0 : i32
    %c0_i32_0 = arith.constant 0 : i32
    %c0_i32_1 = arith.constant 0 : i32
    return %c0_i32, %c0_i32_0 : i32, i32
  }
  func.func @transform_6(%arg0: i32) -> (i32, i32) {
    %c0_i32 = arith.constant 0 : i32
    %c0_i32_0 = arith.constant 0 : i32
    %c0_i32_1 = arith.constant 0 : i32
    return %c0_i32, %c0_i32_0 : i32, i32
  }
  func.func @transform_7(%arg0: i32) -> (i32, i32, i32) {
    %c0_i32 = arith.constant 0 : i32
    %c0_i32_0 = arith.constant 0 : i32
    %c0_i32_1 = arith.constant 0 : i32
    return %arg0, %c0_i32, %c0_i32_0 : i32, i32, i32
  }
}

</mosaic_0001>

<bundles_post_ra>
// kernel: tpu_custom_call.1
= control target key start
LH: loop header
LB: loop body
LE: loop exit
PB: predicated region body
PF: predicated region fallthrough
CT: control target
= control target key end

     0   :  { %12 = vsyncpa [#allocation3], 0  ;;  %s5315_s0 = inlined_call_operand.vmem [shape: bf16[4,22,88], index: 0, kind: input, shape index: {}]   ;;  %s5316_s1 = inlined_call_operand.hbm [shape: bf16[7,88,512], index: 1, kind: input, shape index: {}]   ;;  %s5317_s2 = inlined_call_operand.vmem [shape: f32[1,512], index: 2, kind: input, shape index: {}]   ;;  %s5318_s3 = inlined_call_operand.vmem [shape: f32[1,512], index: 3, kind: input, shape index: {}]   ;;  %s5319_s4 = inlined_call_operand.vmem [shape: f32[512,32], index: 4, kind: input, shape index: {}]   ;;  %s5320_s5 = inlined_call_operand.vmem [shape: f32[32,8], index: 5, kind: input, shape index: {}]   ;;  %s5321_s6 = inlined_call_operand.vmem [shape: f32[1,8], index: 6, kind: input, shape index: {}]   ;;  %s5322_s7 = inlined_call_operand.hbm [shape: f32[2,2,8], index: 7, kind: output, shape index: {}]  }
   0x1   :  { %13 = vsyncpa [#allocation4], 0 }
   0x2   :  { %15 = vsyncpa [#allocation4 + $0x1], 0  ;;  %s4168_s24 = smov 0   ;;  %s4170_s25 = smov 0  }
   0x3   :  { %s4172_s26 = smov 0   ;;  %s4174_s27 = smov 0  }
   0x4 LB: > { %s4189_s28 = sadd.s32 4294967295, %s4119_s27   ;;  %s3346_s29 = sadd.s32 4294967294, %s4119_s27   ;;  %s4119_s27 = sphi %s4174_s27, %s5653_s27   ;;  %s4115_s26 = sphi %s4172_s26, %s5652_s26   ;;  %s4111_s25 = sphi %s4170_s25, %s5651_s25   ;;  %s4107_s24 = sphi %s4168_s24, %s5650_s24  }
   0x5   : > { %s4193_s30 = sadd.s32 1, %s4119_s27   ;;  %s180_s8 = sadd.s32 1, %s4115_s26 }
   0x6   : > { %s177_s9 = ssub.s32 %s4119_s27, %s4193_s30  ;;  %p190_p0 = scmp.ne.s32.totalorder %s4115_s26, %s4111_s25 }
   0x7   : > { %p178_p1 = scmp.eq.s32.totalorder %s177_s9, 0  ;;  %p191_p2 = scmp.eq.s32.totalorder %s4189_s28, 1 }
   0x8   : > { %p196_p3 = scmp.ne.s32.totalorder %s4111_s25, %s4107_s24  ;;  %p197_p4 = scmp.eq.s32.totalorder %s3346_s29, 1 }
   0x9   : > { %s4204_s10 = scalar_select %p178_p1, %s4115_s26, %s180_s8  }
   0xa   : > { %p4206_p5 = por %p191_p2, %p190_p0  ;;  %p4210_p6 = por %p197_p4, %p196_p3 }
   0xb   : > { %p3347_p7 = scmp.ge.s32.totalorder %s4119_s27, 1  ;;  %p204_p8 = scmp.lt.s32.totalorder %s4119_s27, 3 }
   0xc   : > { %s5439_s12 = scalar_select %p4210_p6, 1, 0 }
   0xd   : > { %p3708_p9 = scmp.eq.s32.totalorder %s4189_s28, 0  ;;  %p4217_p10 = pnand %p3347_p7, %p204_p8 }
   0xe   : > { %s4121_s14 = smov [#allocation2]  }
   0xf   : > { %s216_s15 = sshll.u32 %s4121_s14, 4  ;;  %p3700_p11 = pneg %p4217_p10  ;;  %s217_s15 = int_to_ptr.vmem [resolvable:$true] %s216_s15 }
  0x10   : > { %s4040_s16 = scalar_lea.vmem %s217_s15, 19712  ;;  %p4048_p3 = scmp.lt.s32.totalorder %s217_s15, %s217_s15 }
  0x11   : > { %p3701_p12 = pnand %p3708_p9, %p3700_p11  ;;  %p4041_p0 = scmp.ne.s32.totalorder %s217_s15, %s4040_s16 }
  0x12   : > { %p4049_p4 = scmp.lt.s32.totalorder %s4040_s16, %s4040_s16 }
  0x13   : > { %p4031_p13 = pneg %p3701_p12 }
  0x14   : > { %p4050_p6 = por %p4049_p4, %p4048_p3 }
  0x15   : > { %p4043_p1 = pnand %p4041_p0, %p4031_p13 }
  0x17   : > { %p4044_p2 = pneg %p4043_p1 }
  0x19   : > { %p4051_p7 = pnand %p4050_p6, %p4044_p2 }
  0x1b   : > { %4054 = shalt.err (!%p4051_p7)
}
  0x1c   : > { %s4122_s17 = smov 256   ;;  %s4123_s18 = smov 16  }
  0x1d   : > { %3703 = dma.hbm_to_vmem [thread:$0]  (!%p3701_p12), %s5316_s1, 19712, %s217_s15, [#allocation3], %s4122_s17, %s4122_s17, %s4123_s18  }
  0x1e   : > { %257 = sbr.rel (%p4217_p10) target bundleno = 1006 (0x3ee), region = 48 }
  0x23   : > { %4098 = dma.done.wait (%p3708_p9), [#allocation3], 19712  }
  0x24   : > { %4100 = vsyncadd (%p3708_p9), [#allocation3], 4294947584  ;;  %v5323_v0 = vmov 0   ;;  %s3353_s21 = sshll.u32 %s4189_s28, 1  ;;  %v344_v1 = vld [vmem:[#allocation2 + $0x150] sm:$0xff]  ;;  %vm481_vm0 = vcmask 1043456  }
  0x25   : > { %526 = vmatprep.mubr.bf16.mxu0 %v5323_v0  ;;  %569 = vmatprep.mubr.bf16.mxu1 %v5323_v0  ;;  %p291_p6 = scmp.lt.s32.totalorder %s3353_s21, 3  ;;  %v345_v2 = vld [vmem:[#allocation2 + $0x158] sm:$0xff]  ;;  %v4237_v3 = vcombine.high %v344_v1, %v344_v1  ;;  %v3377_v5 = vcombine.low %v344_v1, %v344_v1  ;;  %v3753_v7 = vld [vmem:[#allocation2 + $0x134] ss:$16 sps:$4 sm:$0xff]   ;;  %v3757_v11 = vld [vmem:[#allocation2 + $0x130] ss:$16 sps:$4 sm:$0xff]  }
  0x26   : > { %v4239_v4 = vcombine.high %v345_v2, %v345_v2  ;;  %v3379_v6 = vcombine.low %v345_v2, %v345_v2  ;;  %v3755_v8 = vld [vmem:[#allocation2 + $0x13c] ss:$16 sps:$4 sm:$0xff]   ;;  %v3758_v12 = vld [vmem:[#allocation2 + $0x138] ss:$16 sps:$4 sm:$0xff]   ;;  %v3759_v13 = vld [vmem:[#allocation2 + $0x114] ss:$16 sps:$4 sm:$0xff]  }
  0x27   : > { %s5655_s21 = smov (!%p291_p6, %s3353_s21), 3  ;;  %3381 = vmatprep.subr.msk.bf16.mxu0 %vm481_vm0, %v4237_v3  ;;  %v4246_v9 = vsel %vm481_vm0, %v3377_v5, 0  ;;  %v3761_v14 = vld [vmem:[#allocation2 + $0x11c] ss:$16 sps:$4 sm:$0xff]   ;;  %v3763_v15 = vld [vmem:[#allocation2 + $0x110] ss:$16 sps:$4 sm:$0xff]  }
  0x28   : > { %3383 = vmatprep.subr.msk.bf16.mxu1 %vm481_vm0, %v4239_v4  ;;  %v4249_v10 = vsel %vm481_vm0, %v3379_v6, 0  ;;  %499 = vmatpush1.bf16.msra.mxu0 %v4246_v9  ;;  %s3693_s22 = smul.u32 12, %s5655_s21  ;;  %v3764_v16 = vld [vmem:[#allocation2 + $0x118] ss:$16 sps:$4 sm:$0xff]   ;;  %v3765_v17 = vld [vmem:[#allocation2 + $0xf4] ss:$16 sps:$4 sm:$0xff]  }
  0x29   : > { %542 = vmatpush1.bf16.msra.mxu1 %v4249_v10  ;;  %500 = vmatprep.subr.bf16.mxu0 %v3753_v7  ;;  %v3767_v18 = vld [vmem:[#allocation2 + $0xfc] ss:$16 sps:$4 sm:$0xff]   ;;  %v3769_v19 = vld [vmem:[#allocation2 + $0xf0] ss:$16 sps:$4 sm:$0xff]   ;;  %v3770_v20 = vld [vmem:[#allocation2 + $0xf8] ss:$16 sps:$4 sm:$0xff]  }
  0x2a   : > { %543 = vmatprep.subr.bf16.mxu1 %v3755_v8  ;;  %s4256_s8 = scalar_lea.vmem %s5315_s0, %s3693_s22  ;;  %v3771_v21 = vld [vmem:[#allocation2 + $0xd4] ss:$16 sps:$4 sm:$0xff]   ;;  %v3773_v22 = vld [vmem:[#allocation2 + $0xdc] ss:$16 sps:$4 sm:$0xff]   ;;  %v3775_v23 = vld [vmem:[#allocation2 + $0xd0] ss:$16 sps:$4 sm:$0xff]  }
  0x2b   : > { %v3776_v24 = vld [vmem:[#allocation2 + $0xd8] ss:$16 sps:$4 sm:$0xff]   ;;  %v298_v25 = vld [vmem:[%s4256_s8] sm:$0xf]  ;;  %v4260_v26 = vld [vmem:[%s4256_s8 + $0x4] sm:$0xf] }
  0x2c   : > { %501 = vmatpush1.bf16.msra.mxu0 %v3757_v11  ;;  %v3777_v27 = vld [vmem:[#allocation2 + $0xb4] ss:$16 sps:$4 sm:$0xff]   ;;  %v4263_v28 = vcombine.low %v298_v25, %v4260_v26  ;;  %v4266_v29 = vld [vmem:[%s4256_s8 + $0x8] ss:$0 sps:$4 sm:$0x11]   ;;  %vm477_vm2 = vcmask 719872  }
  0x2d   : > { %544 = vmatpush1.bf16.msra.mxu1 %v3758_v12  ;;  %502 = vmatprep.subr.bf16.mxu0 %v3759_v13  ;;  %v3779_v30 = vld [vmem:[#allocation2 + $0xbc] ss:$16 sps:$4 sm:$0xff]   ;;  %v363_v33 = vshll.u32 %v4266_v29, 16  ;;  %v320_v34 = vld [vmem:[#allocation2 + $0xa0] sm:$0xff]  ;;  %v3782_v38 = vld [vmem:[#allocation2 + $0xb8] ss:$16 sps:$4 sm:$0xff]  }
  0x2e   : > { %545 = vmatprep.subr.bf16.mxu1 %v3761_v14  ;;  %v356_v31 = vshrl.u32 %v4263_v28, 16  ;;  %v358_v32 = vshll.u32 %v4263_v28, 16  ;;  %v321_v35 = vld [vmem:[#allocation2 + $0xa8] sm:$0xff]  ;;  %v3781_v37 = vld [vmem:[#allocation2 + $0xb0] ss:$16 sps:$4 sm:$0xff]   ;;  %v4271_v40 = vcombine.high %v320_v34, %v320_v34  ;;  %v3405_v43 = vcombine.low %v320_v34, %v320_v34  ;;  %s287_s9 = sand.u32 1, %s4111_s25  }
  0x2f   : > { %v365_v39 = vrot.slane %v363_v33, 1  ;;  %v4273_v41 = vcombine.high %v321_v35, %v321_v35  ;;  %vm354_vm1 = vsmask.f32 7424  ;;  %v3407_v44 = vcombine.low %v321_v35, %v321_v35  ;;  %v3791_v46 = vld [vmem:[#allocation2 + $0x84] ss:$16 sps:$4 sm:$0xff]   ;;  %v813_v6 = vld [vmem:[#allocation2 + $0x208] sm:$0xff] }
  0x30   : > { %503 = vmatpush1.bf16.msra.mxu0 %v3763_v15  ;;  %v360_v36 = vrot.slane %v358_v32, 1  ;;  %v4281_v47 = vsel %vm481_vm0, %v3405_v43, 0  ;;  %v3794_v49 = vld [vmem:[#allocation2 + $0x8c] ss:$16 sps:$4 sm:$0xff]   ;;  %v3789_v50 = vld [vmem:[#allocation2 + $0x80] ss:$16 sps:$4 sm:$0xff]   ;;  %v4331_v12 = vcombine.high %v813_v6, %v813_v6  ;;  %v3436_v14 = vcombine.low %v813_v6, %v813_v6 }
  0x31   : > { %546 = vmatpush1.bf16.msra.mxu1 %v3764_v16  ;;  %504 = vmatprep.subr.bf16.mxu0 %v3765_v17  ;;  %v4284_v48 = vsel %vm481_vm0, %v3407_v44, 0  ;;  %v3792_v51 = vld [vmem:[#allocation2 + $0x88] ss:$16 sps:$4 sm:$0xff]   ;;  %v3797_v52 = vld [vmem:[#allocation2 + $0x64] ss:$16 sps:$4 sm:$0xff]   ;;  %vm817_vm3 = vcmask 1046528  }
  0x32   : > { %547 = vmatprep.subr.bf16.mxu1 %v3767_v18  ;;  %v361_v42 = vor.u32 %v360_v36, %v356_v31  ;;  %v3800_v53 = vld [vmem:[#allocation2 + $0x6c] ss:$16 sps:$4 sm:$0xff]   ;;  %v3795_v54 = vld [vmem:[#allocation2 + $0x60] ss:$16 sps:$4 sm:$0xff]   ;;  %v4292_v55 = vld [vmem:[#allocation2 + $0x68] ss:$16 sps:$4 sm:$0xff]  }
  0x33   : > { %v4294_v56 = vld [vmem:[#allocation2 + $0x44] ss:$16 sps:$4 sm:$0xff]   ;;  %v4296_v57 = vld [vmem:[#allocation2 + $0x4c] ss:$16 sps:$4 sm:$0xff]   ;;  %v4298_v58 = vld [vmem:[#allocation2 + $0x40] ss:$16 sps:$4 sm:$0xff]  }
  0x34   : > { %505 = vmatpush1.bf16.msra.mxu0 %v3769_v19  ;;  %v366_v45 = vsel %vm354_vm1, %v361_v42, %v365_v39  ;;  %v4301_v59 = vld [vmem:[#allocation2 + $0x48] ss:$16 sps:$4 sm:$0xff]   ;;  %v4303_v60 = vld [vmem:[#allocation2 + $0x24] ss:$16 sps:$4 sm:$0xff]   ;;  %v4307_v61 = vld [vmem:[#allocation2 + $0x2c] ss:$16 sps:$4 sm:$0xff]  }
  0x35   : > { %548 = vmatpush1.bf16.msra.mxu1 %v3770_v20  ;;  %506 = vmatprep.subr.bf16.mxu0 %v3771_v21  ;;  %v4309_v62 = vld [vmem:[#allocation2 + $0x20] ss:$16 sps:$4 sm:$0xff]   ;;  %v4311_v63 = vld [vmem:[#allocation2 + $0x28] ss:$16 sps:$4 sm:$0xff]   ;;  %v4315_v1 = vld [vmem:[#allocation2 + $0x4] ss:$16 sps:$4 sm:$0xff]  }
  0x36   : > { %549 = vmatprep.subr.bf16.mxu1 %v3773_v22  ;;  %v4317_v2 = vld [vmem:[#allocation2 + $0xc] ss:$16 sps:$4 sm:$0xff]   ;;  %v812_v5 = vld [vmem:[#allocation2 + $0x200] sm:$0xff]  ;;  %v4325_v8 = vld [vmem:[#allocation2 + $0x8] ss:$16 sps:$4 sm:$0xff]   ;;  %v4345_v17 = vsel %vm481_vm0, %v3436_v14, 0 }
  0x37   : > { %v4323_v7 = vld [vmem:[#allocation2] ss:$16 sps:$4 sm:$0xff]   ;;  %v4327_v11 = vcombine.high %v812_v5, %v812_v5  ;;  %v3434_v13 = vcombine.low %v812_v5, %v812_v5  ;;  %v4335_v15 = vld [vmem:[#allocation2 + $0x1e4] ss:$16 sps:$4 sm:$0xff]   ;;  %v4347_v18 = vld [vmem:[#allocation2 + $0x1ec] ss:$16 sps:$4 sm:$0xff]  }
  0x38   : > { %507 = vmatpush1.bf16.msra.mxu0 %v3775_v23  ;;  %v4355_v19 = vld [vmem:[#allocation2 + $0x1e0] ss:$16 sps:$4 sm:$0xff]   ;;  %v4357_v20 = vld [vmem:[#allocation2 + $0x1e8] ss:$16 sps:$4 sm:$0xff]   ;;  %v4361_v21 = vld [vmem:[#allocation2 + $0x1c4] ss:$16 sps:$4 sm:$0xff]  }
  0x39   : > { %550 = vmatpush1.bf16.msra.mxu1 %v3776_v24  ;;  %508 = vmatprep.subr.bf16.mxu0 %v3777_v27  ;;  %v4342_v16 = vsel %vm481_vm0, %v3434_v13, 0  ;;  %v4363_v22 = vld [vmem:[#allocation2 + $0x1cc] ss:$16 sps:$4 sm:$0xff]   ;;  %v4369_v23 = vld [vmem:[#allocation2 + $0x1c0] ss:$16 sps:$4 sm:$0xff]   ;;  %vm1331_vm5 = vcmask 1045504  }
  0x3a   : > { %551 = vmatprep.subr.bf16.mxu1 %v3779_v30  ;;  %v4371_v24 = vld [vmem:[#allocation2 + $0x1c8] ss:$16 sps:$4 sm:$0xff]   ;;  %v4375_v25 = vld [vmem:[#allocation2 + $0x1a4] ss:$16 sps:$4 sm:$0xff]   ;;  %v4377_v27 = vld [vmem:[#allocation2 + $0x1ac] ss:$16 sps:$4 sm:$0xff]  }
  0x3b   : > { %v4383_v30 = vld [vmem:[#allocation2 + $0x1a8] ss:$16 sps:$4 sm:$0xff]   ;;  %v4385_v31 = vld [vmem:[#allocation2 + $0x184] ss:$16 sps:$4 sm:$0xff]   ;;  %v4387_v32 = vld [vmem:[#allocation2 + $0x18c] ss:$16 sps:$4 sm:$0xff]  }
  0x3c   : > { %509 = vmatpush1.bf16.msra.mxu0 %v3781_v37  ;;  %v790_v33 = vld [vmem:[%s4256_s8] sm:$0xe]  ;;  %v4394_v35 = vld [vmem:[#allocation2 + $0x188] ss:$16 sps:$4 sm:$0xff]   ;;  %v4396_v36 = vld [vmem:[#allocation2 + $0x164] ss:$16 sps:$4 sm:$0xff]  }
  0x3d   : > { %552 = vmatpush1.bf16.msra.mxu1 %v3782_v38  ;;  %3409 = vmatprep.subr.msk.bf16.mxu0 %vm481_vm0, %v4271_v40  ;;  %v4392_v34 = vld [vmem:[#allocation2 + $0x180] ss:$16 sps:$4 sm:$0xff]   ;;  %v4400_v37 = vld [vmem:[#allocation2 + $0x16c] ss:$16 sps:$4 sm:$0xff]   ;;  %v3413_v38 = vcombine.low %v790_v33, %v4260_v26  ;;  %v4409_v44 = vld [vmem:[#allocation2 + $0x168] ss:$16 sps:$4 sm:$0xff]  }
  0x3e   : > { %3411 = vmatprep.subr.msk.bf16.mxu1 %vm481_vm0, %v4273_v41  ;;  %v1062_v39 = vld [vmem:[#allocation2 + $0x2b0] sm:$0xff]  ;;  %v1063_v42 = vld [vmem:[#allocation2 + $0x2b8] sm:$0xff]  ;;  %5442 = vst [vmem:[#allocation9_spill] sm:$0xff] %v4409_v44  ;;  %vm1067_vm4 = vsmask.f32 6400  ;;  %vm1845_vm7 = vcmask 1044480  }
  0x3f   : > { %3382 = vmatmul.mubr.msk.bf16.vlgmr.msra.gmra.mxu0 %vm477_vm2, %v366_v45  ;;  %v4405_v43 = vld [vmem:[#allocation2 + $0x160] ss:$16 sps:$4 sm:$0xff]   ;;  %v4431_v5 = vld [vmem:[#allocation2 + $0x294] ss:$16 sps:$4 sm:$0xff]   ;;  %v4433_v6 = vld [vmem:[#allocation2 + $0x29c] ss:$16 sps:$4 sm:$0xff]  }
  0x40   : > { %3384 = vmatmul.mubr.msk.bf16.vlgmr.msra.gmra.mxu1 %vm477_vm2, %v366_v45  ;;  %709 = vmatpush1.bf16.msra.mxu0 %v4281_v47  ;;  %5441 = vst [vmem:[#allocation8_spill] sm:$0xff] %v4405_v43  ;;  %v818_v45 = vrot.slane %v3413_v38, 1  ;;  %5447 = vst [vmem:[#allocation14_spill] sm:$0xff] %v4431_v5  ;;  %v4437_v13 = vld [vmem:[#allocation2 + $0x290] ss:$16 sps:$4 sm:$0xff]   ;;  %vm2965_vm8 = vcmask 1040384  }
  0x41   : > { %752 = vmatpush1.bf16.msra.mxu1 %v4284_v48  ;;  %710 = vmatprep.subr.bf16.mxu0 %v3791_v46  ;;  %v819_v46 = vrot.slane %v4266_v29, 1  ;;  %5448 = vst [vmem:[#allocation15_spill] sm:$0xff] %v4433_v6  ;;  %5449 = vst [vmem:[#allocation16_spill] sm:$0xff] %v4437_v13  ;;  %v4441_v14 = vld [vmem:[#allocation2 + $0x298] ss:$16 sps:$4 sm:$0xff]   ;;  %vm4126_vm9 = vmmov 0  }
  0x42   : > { %753 = vmatprep.subr.bf16.mxu1 %v3794_v49  ;;  %736 = vmatprep.mubr.bf16.mxu0 %v5323_v0  ;;  %v4412_v49 = vcombine.high %v1062_v39, %v1062_v39  ;;  %5450 = vst [vmem:[#allocation17_spill] sm:$0xff] %v4441_v14  ;;  %v4445_v33 = vld [vmem:[#allocation2 + $0x274] ss:$16 sps:$4 sm:$0xff]   ;;  %vm1581_vm6 = vsmask.f32 5376  ;;  %vm3185_vm10 = vcmask 261120  }
  0x43   : > { %779 = vmatprep.mubr.bf16.mxu1 %v5323_v0  ;;  %5451 = vst [vmem:[#allocation18_spill] sm:$0xff] %v4445_v33  ;;  %s3352_s13 = sshll.u32 %s287_s9, 1  ;;  %s3604_s16 = sshll.u32 %s4189_s28, 5  ;;  %vm3259_vm11 = vcmask 58368  }
  0x44   : > { %711 = vmatpush1.bf16.msra.mxu0 %v3789_v50  ;;  %5443 = vst [vmem:[#allocation10_spill] sm:$0xff] %v4412_v49  ;;  %v4416_v50 = vcombine.high %v1063_v42, %v1063_v42  ;;  %s289_s17 = scalar_lea.vmem [#allocation5], %s3352_s13  ;;  %s5280_s21 = scalar_lea.hbm %s5322_s7, %s3604_s16 }
  0x45   : > { %754 = vmatpush1.bf16.msra.mxu1 %v3792_v51  ;;  %712 = vmatprep.subr.bf16.mxu0 %v3797_v52  ;;  %v3463_v51 = vcombine.low %v1062_v39, %v1062_v39  ;;  %v3465_v52 = vcombine.low %v1063_v42, %v1063_v42  ;;  %v4447_v39 = vld [vmem:[#allocation2 + $0x27c] ss:$16 sps:$4 sm:$0xff]   ;;  %v4451_v42 = vld [vmem:[#allocation2 + $0x270] ss:$16 sps:$4 sm:$0xff]   ;;  %s3275_s18 = sshll.u32 %s289_s17, 4  ;;  %s3262_s22 = scalar_lea.sflag [#allocation4], %s287_s9  ;;  %s3276_s18 = int_to_ptr.vmem [resolvable:$true] %s3275_s18 }
  0x46   : > { %755 = vmatprep.subr.bf16.mxu1 %v3800_v53  ;;  %5444 = vst [vmem:[#allocation11_spill] sm:$0xff] %v4416_v50  ;;  %v820_v53 = vsel %vm817_vm3, %v818_v45, %v819_v46  ;;  %5452 = vst [vmem:[#allocation19_spill] sm:$0xff] %v4447_v39  ;;  %v4453_v45 = vld [vmem:[#allocation2 + $0x278] ss:$16 sps:$4 sm:$0xff]   ;;  %v4457_v46 = vld [vmem:[#allocation2 + $0x254] ss:$16 sps:$4 sm:$0xff]  }
  0x47   : > { %v4426_v29 = vsel %vm481_vm0, %v3463_v51, 0  ;;  %5453 = vst [vmem:[#allocation20_spill] sm:$0xff] %v4451_v42  ;;  %5454 = vst [vmem:[#allocation21_spill] sm:$0xff] %v4453_v45  ;;  %v4460_v51 = vld [vmem:[%s4256_s8 + $0x8] ss:$0 sps:$4 sm:$0x33]  }
  0x48   : > { %713 = vmatpush1.bf16.msra.mxu0 %v3795_v54  ;;  %5445 = vst [vmem:[#allocation12_spill] sm:$0xff] %v4426_v29  ;;  %v4429_v54 = vsel %vm481_vm0, %v3465_v52, 0  ;;  %5455 = vst [vmem:[#allocation22_spill] sm:$0xff] %v4457_v46  ;;  %v4464_v52 = vld [vmem:[#allocation2 + $0x25c] ss:$16 sps:$4 sm:$0xff]   ;;  %s4055_s23 = scalar_lea.vmem %s3276_s18, 32 }
  0x49   : > { %756 = vmatpush1.bf16.msra.mxu1 %v4292_v55  ;;  %714 = vmatprep.subr.bf16.mxu0 %v4294_v56  ;;  %5446 = vst [vmem:[#allocation13_spill] sm:$0xff] %v4429_v54  ;;  %5456 = vst [vmem:[#allocation23_spill] sm:$0xff] %v4464_v52  ;;  %p4056_p8 = scmp.ne.s32.totalorder %s3276_s18, %s4055_s23  ;;  %s4127_s28 = smov [#allocation5]  }
  0x4a   : > { %757 = vmatprep.subr.bf16.mxu1 %v4296_v57  ;;  %s4059_s29 = sshll.u32 %s4127_s28, 4  ;;  %s4060_s29 = int_to_ptr.vmem [resolvable:$false] %s4059_s29 }
  0x4b   : > { %p4057_p9 = pnand %p4056_p8, %p4206_p5  ;;  %p4062_p11 = scmp.lt.s32.totalorder %s3276_s18, %s4060_s29 }
  0x4c   : > { %715 = vmatpush1.bf16.msra.mxu0 %v4298_v58 }
  0x4d   : > { %758 = vmatpush1.bf16.msra.mxu1 %v4301_v59  ;;  %716 = vmatprep.subr.bf16.mxu0 %v4303_v60  ;;  %p4058_p10 = pneg %p4057_p9 }
  0x4e   : > { %759 = vmatprep.subr.bf16.mxu1 %v4307_v61 }
  0x50   : > { %717 = vmatpush1.bf16.msra.mxu0 %v4309_v62 }
  0x51   : > { %760 = vmatpush1.bf16.msra.mxu1 %v4311_v63  ;;  %718 = vmatprep.subr.bf16.mxu0 %v4315_v1 }
  0x52   : > { %761 = vmatprep.subr.bf16.mxu1 %v4317_v2 }
  0x54   : > { %719 = vmatpush1.bf16.msra.mxu0 %v4323_v7 }
  0x55   : > { %762 = vmatpush1.bf16.msra.mxu1 %v4325_v8  ;;  %3438 = vmatprep.subr.msk.bf16.mxu0 %vm481_vm0, %v4327_v11 }
  0x56   : > { %3440 = vmatprep.subr.msk.bf16.mxu1 %vm481_vm0, %v4331_v12 }
  0x57   : > { %3410 = vmatmul.mubr.msk.bf16.vlgmr.msra.gmra.mxu0 %vm477_vm2, %v4263_v28 }
  0x58   : > { %3412 = vmatmul.mubr.msk.bf16.vlgmr.msra.gmra.mxu1 %vm477_vm2, %v4263_v28  ;;  %951 = vmatpush1.bf16.msra.mxu0 %v4342_v16  ;;  %v4379_v28 = vld [vmem:[#allocation2 + $0x1a0] ss:$16 sps:$4 sm:$0xff]  }
  0x59   : > { %994 = vmatpush1.bf16.msra.mxu1 %v4345_v17  ;;  %952 = vmatprep.subr.bf16.mxu0 %v4335_v15 }
  0x5a   : > { %995 = vmatprep.subr.bf16.mxu1 %v4347_v18  ;;  %978 = vmatprep.mubr.bf16.mxu0 %v5323_v0 }
  0x5b   : > { %1021 = vmatprep.mubr.bf16.mxu1 %v5323_v0 }
  0x5c   : > { %953 = vmatpush1.bf16.msra.mxu0 %v4355_v19 }
  0x5d   : > { %996 = vmatpush1.bf16.msra.mxu1 %v4357_v20  ;;  %954 = vmatprep.subr.bf16.mxu0 %v4361_v21 }
  0x5e   : > { %997 = vmatprep.subr.bf16.mxu1 %v4363_v22 }
  0x60   : > { %955 = vmatpush1.bf16.msra.mxu0 %v4369_v23 }
  0x61   : > { %998 = vmatpush1.bf16.msra.mxu1 %v4371_v24  ;;  %956 = vmatprep.subr.bf16.mxu0 %v4375_v25 }
  0x62   : > { %999 = vmatprep.subr.bf16.mxu1 %v4377_v27 }
  0x64   : > { %957 = vmatpush1.bf16.msra.mxu0 %v4379_v28 }
  0x65   : > { %1000 = vmatpush1.bf16.msra.mxu1 %v4383_v30  ;;  %958 = vmatprep.subr.bf16.mxu0 %v4385_v31 }
  0x66   : > { %1001 = vmatprep.subr.bf16.mxu1 %v4387_v32 }
  0x68   : > { %959 = vmatpush1.bf16.msra.mxu0 %v4392_v34 }
  0x69   : > { %1002 = vmatpush1.bf16.msra.mxu1 %v4394_v35  ;;  %960 = vmatprep.subr.bf16.mxu0 %v4396_v36 }
  0x6a   : > { %1003 = vmatprep.subr.bf16.mxu1 %v4400_v37 }
  0x6c   : > { %961 = vmatpush1.bf16.msra.mxu0 %v4405_v43 }
  0x6d   : > { %1004 = vmatpush1.bf16.msra.mxu1 %v4409_v44  ;;  %3467 = vmatprep.subr.msk.bf16.mxu0 %vm481_vm0, %v4412_v49 }
  0x6e   : > { %3469 = vmatprep.subr.msk.bf16.mxu1 %vm481_vm0, %v4416_v50  ;;  %v4482_v50 = vld [vmem:[#allocation2 + $0x238] ss:$16 sps:$4 sm:$0xff]  }
  0x6f   : > { %3439 = vmatmul.mubr.msk.bf16.vlgmr.msra.gmra.mxu0 %vm477_vm2, %v820_v53  ;;  %5461 = vst [vmem:[#allocation28_spill] sm:$0xff] %v4482_v50 }
  0x70   : > { %3441 = vmatmul.mubr.msk.bf16.vlgmr.msra.gmra.mxu1 %vm477_vm2, %v820_v53  ;;  %1215 = vmatpush1.bf16.msra.mxu0 %v4426_v29  ;;  %v1069_v53 = vshrl.u32 %v3413_v38, 16  ;;  %v4480_v29 = vld [vmem:[#allocation2 + $0x230] ss:$16 sps:$4 sm:$0xff]  }
  0x71   : > { %1258 = vmatpush1.bf16.msra.mxu1 %v4429_v54  ;;  %1216 = vmatprep.subr.bf16.mxu0 %v4431_v5  ;;  %v4468_v5 = vld [vmem:[#allocation2 + $0x258] ss:$16 sps:$4 sm:$0xff]   ;;  %5460 = vst [vmem:[#allocation27_spill] sm:$0xff] %v4480_v29 }
  0x72   : > { %1259 = vmatprep.subr.bf16.mxu1 %v4433_v6  ;;  %1242 = vmatprep.mubr.bf16.mxu0 %v5323_v0  ;;  %v4466_v6 = vld [vmem:[#allocation2 + $0x250] ss:$16 sps:$4 sm:$0xff]   ;;  %5458 = vst [vmem:[#allocation25_spill] sm:$0xff] %v4468_v5 }
  0x73   : > { %1285 = vmatprep.mubr.bf16.mxu1 %v5323_v0  ;;  %v1072_v0 = vshll.u32 %v3413_v38, 16  ;;  %5457 = vst [vmem:[#allocation24_spill] sm:$0xff] %v4466_v6  ;;  %v1071_v38 = vrot.slane %v1069_v53, 1  ;;  %v1326_v53 = vld [vmem:[#allocation2 + $0x360] sm:$0xff] }
  0x74   : > { %1217 = vmatpush1.bf16.msra.mxu0 %v4437_v13  ;;  %v1077_v13 = vshrl.u32 %v4460_v51, 16  ;;  %v4498_v43 = vcombine.high %v1326_v53, %v1326_v53 }
  0x75   : > { %1260 = vmatpush1.bf16.msra.mxu1 %v4441_v14  ;;  %1218 = vmatprep.subr.bf16.mxu0 %v4445_v33  ;;  %v4472_v14 = vld [vmem:[#allocation2 + $0x234] ss:$16 sps:$4 sm:$0xff]   ;;  %v1080_v33 = vshll.u32 %v4460_v51, 16  ;;  %v1074_v54 = vrot.slane %v1072_v0, 2  ;;  %v1327_v0 = vld [vmem:[#allocation2 + $0x368] sm:$0xff] }
  0x76   : > { %1261 = vmatprep.subr.bf16.mxu1 %v4447_v39  ;;  %v4478_v39 = vld [vmem:[#allocation2 + $0x23c] ss:$16 sps:$4 sm:$0xff]   ;;  %v1079_v49 = vrot.slane %v1077_v13, 1  ;;  %5466 = vst [vmem:[#allocation33_spill] sm:$0xff] %v4498_v43  ;;  %v4502_v13 = vcombine.high %v1327_v0, %v1327_v0 }
  0x77   : > { %5459 = vst [vmem:[#allocation26_spill] sm:$0xff] %v4478_v39 }
  0x78   : > { %1219 = vmatpush1.bf16.msra.mxu0 %v4451_v42  ;;  %v4488_v42 = vld [vmem:[#allocation2 + $0x21c] ss:$16 sps:$4 sm:$0xff]   ;;  %5467 = vst [vmem:[#allocation34_spill] sm:$0xff] %v4502_v13 }
  0x79   : > { %1262 = vmatpush1.bf16.msra.mxu1 %v4453_v45  ;;  %1220 = vmatprep.subr.bf16.mxu0 %v4457_v46  ;;  %v4486_v45 = vld [vmem:[#allocation2 + $0x214] ss:$16 sps:$4 sm:$0xff]   ;;  %5463 = vst [vmem:[#allocation30_spill] sm:$0xff] %v4488_v42  ;;  %v1082_v46 = vrot.slane %v1080_v33, 2  ;;  %v3492_v33 = vcombine.low %v1326_v53, %v1326_v53  ;;  %v5476_v53 = vmov 0  }
  0x7a   : > { %1263 = vmatprep.subr.bf16.mxu1 %v4464_v52  ;;  %5462 = vst [vmem:[#allocation29_spill] sm:$0xff] %v4486_v45  ;;  %v4494_v52 = vld [vmem:[#allocation2 + $0x210] ss:$16 sps:$4 sm:$0xff]  }
  0x7b   : > { %5464 = vst [vmem:[#allocation31_spill] sm:$0xff] %v4494_v52  ;;  %v1083_v44 = vor.u32 %v1082_v46, %v1079_v49  ;;  %v4514_v49 = vsel %vm481_vm0, %v3492_v33, 0  ;;  %v4519_v46 = vld [vmem:[#allocation2 + $0x34c] ss:$16 sps:$4 sm:$0xff]   ;;  %v4545_v33 = vld [vmem:[#allocation2 + $0x304] ss:$16 sps:$4 sm:$0xff]  }
  0x7c   : > { %1221 = vmatpush1.bf16.msra.mxu0 %v4466_v6  ;;  %v4496_v6 = vld [vmem:[#allocation2 + $0x218] ss:$16 sps:$4 sm:$0xff]   ;;  %5469 = vst [vmem:[#allocation36_spill] sm:$0xff] %v4514_v49  ;;  %5471 = vst [vmem:[#allocation38_spill] sm:$0xff] %v4519_v46 }
  0x7d   : > { %1264 = vmatpush1.bf16.msra.mxu1 %v4468_v5  ;;  %1222 = vmatprep.subr.bf16.mxu0 %v4472_v14  ;;  %5465 = vst [vmem:[#allocation32_spill] sm:$0xff] %v4496_v6  ;;  %v1075_v5 = vor.u32 %v1074_v54, %v1071_v38  ;;  %v4529_v38 = vld [vmem:[#allocation2 + $0x324] ss:$16 sps:$4 sm:$0xff]   ;;  %5479 = vst [vmem:[#allocation45_spill] sm:$0xff] %v4545_v33 }
  0x7e   : > { %1265 = vmatprep.subr.bf16.mxu1 %v4478_v39  ;;  %v3494_v39 = vcombine.low %v1327_v0, %v1327_v0  ;;  %5474 = vst [vmem:[#allocation41_spill] sm:$0xff] %v4529_v38  ;;  %v4541_v0 = vld [vmem:[#allocation2 + $0x328] ss:$16 sps:$4 sm:$0xff]  }
  0x7f   : > { %5478 = vst [vmem:[#allocation44_spill] sm:$0xff] %v4541_v0 }
  0x80   : > { %1223 = vmatpush1.bf16.msra.mxu0 %v4480_v29  ;;  %v4507_v29 = vld [vmem:[#allocation2 + $0x344] ss:$16 sps:$4 sm:$0xff]   ;;  %v4517_v54 = vsel %vm481_vm0, %v3494_v39, 0  ;;  %v4533_v39 = vld [vmem:[#allocation2 + $0x32c] ss:$16 sps:$4 sm:$0xff]  }
  0x81   : > { %1266 = vmatpush1.bf16.msra.mxu1 %v4482_v50  ;;  %1224 = vmatprep.subr.bf16.mxu0 %v4486_v45  ;;  %v1084_v50 = vsel %vm1067_vm4, %v1075_v5, %v1083_v44  ;;  %5468 = vst [vmem:[#allocation35_spill] sm:$0xff] %v4507_v29  ;;  %5470 = vst [vmem:[#allocation37_spill] sm:$0xff] %v4517_v54  ;;  %v4523_v44 = vld [vmem:[#allocation2 + $0x340] ss:$16 sps:$4 sm:$0xff]   ;;  %v4525_v5 = vld [vmem:[#allocation2 + $0x348] ss:$16 sps:$4 sm:$0xff]  }
  0x82   : > { %1267 = vmatprep.subr.bf16.mxu1 %v4488_v42  ;;  %5472 = vst [vmem:[#allocation39_spill] sm:$0xff] %v4523_v44  ;;  %5473 = vst [vmem:[#allocation40_spill] sm:$0xff] %v4525_v5 }
  0x83   : > { %5475 = vst [vmem:[#allocation42_spill] sm:$0xff] %v4533_v39 }
  0x84   : > { %1225 = vmatpush1.bf16.msra.mxu0 %v4494_v52 }
  0x85   : > { %1268 = vmatpush1.bf16.msra.mxu1 %v4496_v6  ;;  %3496 = vmatprep.subr.msk.bf16.mxu0 %vm481_vm0, %v4498_v43 }
  0x86   : > { %3498 = vmatprep.subr.msk.bf16.mxu1 %vm481_vm0, %v4502_v13  ;;  %v1577_v13 = vld [vmem:[#allocation2 + $0x418] sm:$0xff] }
  0x87   : > { %3468 = vmatmul.mubr.msk.bf16.vlgmr.msra.gmra.mxu0 %vm477_vm2, %v1084_v50  ;;  %v3523_v43 = vcombine.low %v1577_v13, %v1577_v13 }
  0x88   : > { %3470 = vmatmul.mubr.msk.bf16.vlgmr.msra.gmra.mxu1 %vm477_vm2, %v1084_v50  ;;  %1465 = vmatpush1.bf16.msra.mxu0 %v4514_v49  ;;  %v4539_v50 = vld [vmem:[#allocation2 + $0x320] ss:$16 sps:$4 sm:$0xff]  }
  0x89   : > { %1508 = vmatpush1.bf16.msra.mxu1 %v4517_v54  ;;  %1466 = vmatprep.subr.bf16.mxu0 %v4507_v29  ;;  %5477 = vst [vmem:[#allocation43_spill] sm:$0xff] %v4539_v50  ;;  %v4553_v29 = vld [vmem:[#allocation2 + $0x308] ss:$16 sps:$4 sm:$0xff]   ;;  %v1576_v49 = vld [vmem:[#allocation2 + $0x410] sm:$0xff] }
  0x8a   : > { %1509 = vmatprep.subr.bf16.mxu1 %v4519_v46  ;;  %1492 = vmatprep.mubr.bf16.mxu0 %v5476_v53  ;;  %v4547_v46 = vld [vmem:[#allocation2 + $0x30c] ss:$16 sps:$4 sm:$0xff]   ;;  %5482 = vst [vmem:[#allocation48_spill] sm:$0xff] %v4553_v29 }
  0x8b   : > { %1535 = vmatprep.mubr.bf16.mxu1 %v5476_v53  ;;  %5480 = vst [vmem:[#allocation46_spill] sm:$0xff] %v4547_v46 }
  0x8c   : > { %1467 = vmatpush1.bf16.msra.mxu0 %v4523_v44  ;;  %v4551_v44 = vld [vmem:[#allocation2 + $0x300] ss:$16 sps:$4 sm:$0xff]  }
  0x8d   : > { %1510 = vmatpush1.bf16.msra.mxu1 %v4525_v5  ;;  %1468 = vmatprep.subr.bf16.mxu0 %v4529_v38  ;;  %5481 = vst [vmem:[#allocation47_spill] sm:$0xff] %v4551_v44  ;;  %v4557_v5 = vld [vmem:[#allocation2 + $0x2e4] ss:$16 sps:$4 sm:$0xff]   ;;  %v4559_v38 = vld [vmem:[#allocation2 + $0x2ec] ss:$16 sps:$4 sm:$0xff]  }
  0x8e   : > { %1511 = vmatprep.subr.bf16.mxu1 %v4533_v39  ;;  %5483 = vst [vmem:[#allocation49_spill] sm:$0xff] %v4557_v5  ;;  %5484 = vst [vmem:[#allocation50_spill] sm:$0xff] %v4559_v38  ;;  %v1304_v39 = vld [vmem:[%s4256_s8] sm:$0xc] }
  0x8f   : > { %v4569_v54 = vcombine.low %v1304_v39, %v4260_v26  ;;  %v1333_v39 = vrot.slane %v4460_v51, 2 }
  0x90   : > { %1469 = vmatpush1.bf16.msra.mxu0 %v4539_v50  ;;  %v4564_v50 = vld [vmem:[#allocation2 + $0x2e0] ss:$16 sps:$4 sm:$0xff]  }
  0x91   : > { %1512 = vmatpush1.bf16.msra.mxu1 %v4541_v0  ;;  %1470 = vmatprep.subr.bf16.mxu0 %v4545_v33  ;;  %5485 = vst [vmem:[#allocation51_spill] sm:$0xff] %v4564_v50  ;;  %v4566_v0 = vld [vmem:[#allocation2 + $0x2e8] ss:$16 sps:$4 sm:$0xff]   ;;  %v4575_v33 = vld [vmem:[#allocation2 + $0x2cc] ss:$16 sps:$4 sm:$0xff]   ;;  %v1332_v26 = vrot.slane %v4569_v54, 2 }
  0x92   : > { %1513 = vmatprep.subr.bf16.mxu1 %v4547_v46  ;;  %5486 = vst [vmem:[#allocation52_spill] sm:$0xff] %v4566_v0  ;;  %v4573_v46 = vld [vmem:[#allocation2 + $0x2c4] ss:$16 sps:$4 sm:$0xff]   ;;  %5488 = vst [vmem:[#allocation54_spill] sm:$0xff] %v4575_v33 }
  0x93   : > { %5487 = vst [vmem:[#allocation53_spill] sm:$0xff] %v4573_v46 }
  0x94   : > { %1471 = vmatpush1.bf16.msra.mxu0 %v4551_v44  ;;  %v4581_v44 = vld [vmem:[#allocation2 + $0x2c8] ss:$16 sps:$4 sm:$0xff]  }
  0x95   : > { %1514 = vmatpush1.bf16.msra.mxu1 %v4553_v29  ;;  %1472 = vmatprep.subr.bf16.mxu0 %v4557_v5  ;;  %v4579_v29 = vld [vmem:[#allocation2 + $0x2c0] ss:$16 sps:$4 sm:$0xff]   ;;  %5490 = vst [vmem:[#allocation56_spill] sm:$0xff] %v4581_v44  ;;  %v4585_v5 = vcombine.high %v1576_v49, %v1576_v49 }
  0x96   : > { %1515 = vmatprep.subr.bf16.mxu1 %v4559_v38  ;;  %5489 = vst [vmem:[#allocation55_spill] sm:$0xff] %v4579_v29  ;;  %v4589_v38 = vcombine.high %v1577_v13, %v1577_v13  ;;  %v4606_v13 = vld [vmem:[#allocation2 + $0x3fc] ss:$16 sps:$4 sm:$0xff]  }
  0x97   : > { %5491 = vst [vmem:[#allocation57_spill] sm:$0xff] %v4585_v5  ;;  %5496 = vst [vmem:[#allocation62_spill] sm:$0xff] %v4606_v13 }
  0x98   : > { %1473 = vmatpush1.bf16.msra.mxu0 %v4564_v50  ;;  %5492 = vst [vmem:[#allocation58_spill] sm:$0xff] %v4589_v38  ;;  %v3521_v50 = vcombine.low %v1576_v49, %v1576_v49  ;;  %v4604_v49 = vld [vmem:[#allocation2 + $0x3f4] ss:$16 sps:$4 sm:$0xff]  }
  0x99   : > { %1516 = vmatpush1.bf16.msra.mxu1 %v4566_v0  ;;  %1474 = vmatprep.subr.bf16.mxu0 %v4573_v46  ;;  %v1334_v0 = vsel %vm1331_vm5, %v1332_v26, %v1333_v39  ;;  %5495 = vst [vmem:[#allocation61_spill] sm:$0xff] %v4604_v49  ;;  %v4612_v26 = vld [vmem:[#allocation2 + $0x3f0] ss:$16 sps:$4 sm:$0xff]   ;;  %v4620_v39 = vld [vmem:[#allocation2 + $0x3dc] ss:$16 sps:$4 sm:$0xff]  }
  0x9a   : > { %1517 = vmatprep.subr.bf16.mxu1 %v4575_v33  ;;  %v4599_v51 = vsel %vm481_vm0, %v3521_v50, 0  ;;  %v4602_v33 = vsel %vm481_vm0, %v3523_v43, 0  ;;  %5497 = vst [vmem:[#allocation63_spill] sm:$0xff] %v4612_v26  ;;  %v4614_v50 = vld [vmem:[#allocation2 + $0x3f8] ss:$16 sps:$4 sm:$0xff]   ;;  %5500 = vst [vmem:[#allocation66_spill] sm:$0xff] %v4620_v39 }
  0x9b   : > { %5493 = vst [vmem:[#allocation59_spill] sm:$0xff] %v4599_v51  ;;  %5494 = vst [vmem:[#allocation60_spill] sm:$0xff] %v4602_v33  ;;  %v4618_v43 = vld [vmem:[#allocation2 + $0x3d4] ss:$16 sps:$4 sm:$0xff]   ;;  %v4659_v46 = vld [vmem:[#allocation2 + $0x398] ss:$16 sps:$4 sm:$0xff]  }
  0x9c   : > { %1475 = vmatpush1.bf16.msra.mxu0 %v4579_v29  ;;  %5498 = vst [vmem:[#allocation64_spill] sm:$0xff] %v4614_v50  ;;  %5499 = vst [vmem:[#allocation65_spill] sm:$0xff] %v4618_v43  ;;  %v4653_v29 = vld [vmem:[#allocation2 + $0x39c] ss:$16 sps:$4 sm:$0xff]  }
  0x9d   : > { %1518 = vmatpush1.bf16.msra.mxu1 %v4581_v44  ;;  %3525 = vmatprep.subr.msk.bf16.mxu0 %vm481_vm0, %v4585_v5  ;;  %v1586_v5 = vshll.u32 %v4569_v54, 16  ;;  %v4651_v44 = vld [vmem:[#allocation2 + $0x394] ss:$16 sps:$4 sm:$0xff]   ;;  %5508 = vst [vmem:[#allocation74_spill] sm:$0xff] %v4653_v29  ;;  %5509 = vst [vmem:[#allocation75_spill] sm:$0xff] %v4659_v46 }
  0x9e   : > { %3527 = vmatprep.subr.msk.bf16.mxu1 %vm481_vm0, %v4589_v38  ;;  %v1583_v38 = vshrl.u32 %v4569_v54, 16  ;;  %5507 = vst [vmem:[#allocation73_spill] sm:$0xff] %v4651_v44 }
  0x9f   : > { %3497 = vmatmul.mubr.msk.bf16.vlgmr.msra.gmra.mxu0 %vm477_vm2, %v1334_v0 }
  0xa0   : > { %3499 = vmatmul.mubr.msk.bf16.vlgmr.msra.gmra.mxu1 %vm477_vm2, %v1334_v0  ;;  %1729 = vmatpush1.bf16.msra.mxu0 %v4599_v51  ;;  %v4624_v0 = vld [vmem:[#allocation2 + $0x3d0] ss:$16 sps:$4 sm:$0xff]   ;;  %v4631_v51 = vld [vmem:[%s4256_s8 + $0x8] ss:$0 sps:$4 sm:$0x77]   ;;  %v1585_v54 = vrot.slane %v1583_v38, 2 }
  0xa1   : > { %1772 = vmatpush1.bf16.msra.mxu1 %v4602_v33  ;;  %1730 = vmatprep.subr.bf16.mxu0 %v4604_v49  ;;  %5501 = vst [vmem:[#allocation67_spill] sm:$0xff] %v4624_v0  ;;  %v4628_v33 = vld [vmem:[#allocation2 + $0x3d8] ss:$16 sps:$4 sm:$0xff]   ;;  %v4637_v49 = vld [vmem:[#allocation2 + $0x3bc] ss:$16 sps:$4 sm:$0xff]   ;;  %v1840_v38 = vld [vmem:[#allocation2 + $0x4c0] sm:$0xff] }
  0xa2   : > { %1773 = vmatprep.subr.bf16.mxu1 %v4606_v13  ;;  %1756 = vmatprep.mubr.bf16.mxu0 %v5476_v53  ;;  %5502 = vst [vmem:[#allocation68_spill] sm:$0xff] %v4628_v33  ;;  %v4635_v13 = vld [vmem:[#allocation2 + $0x3b4] ss:$16 sps:$4 sm:$0xff]   ;;  %5504 = vst [vmem:[#allocation70_spill] sm:$0xff] %v4637_v49  ;;  %v4673_v42 = vcombine.high %v1840_v38, %v1840_v38 }
  0xa3   : > { %1799 = vmatprep.mubr.bf16.mxu1 %v5476_v53  ;;  %5503 = vst [vmem:[#allocation69_spill] sm:$0xff] %v4635_v13 }
  0xa4   : > { %1731 = vmatpush1.bf16.msra.mxu0 %v4612_v26  ;;  %v4645_v26 = vld [vmem:[#allocation2 + $0x3b8] ss:$16 sps:$4 sm:$0xff]   ;;  %5510 = vst [vmem:[#allocation76_spill] sm:$0xff] %v4673_v42 }
  0xa5   : > { %1774 = vmatpush1.bf16.msra.mxu1 %v4614_v50  ;;  %1732 = vmatprep.subr.bf16.mxu0 %v4618_v43  ;;  %v4643_v50 = vld [vmem:[#allocation2 + $0x3b0] ss:$16 sps:$4 sm:$0xff]   ;;  %5506 = vst [vmem:[#allocation72_spill] sm:$0xff] %v4645_v26  ;;  %v1591_v43 = vshrl.u32 %v4631_v51, 16 }
  0xa6   : > { %1775 = vmatprep.subr.bf16.mxu1 %v4620_v39  ;;  %5505 = vst [vmem:[#allocation71_spill] sm:$0xff] %v4643_v50  ;;  %v1594_v39 = vshll.u32 %v4631_v51, 16 }
  0xa7   : > { %v1593_v6 = vrot.slane %v1591_v43, 2 }
  0xa8   : > { %1733 = vmatpush1.bf16.msra.mxu0 %v4624_v0  ;;  %v1588_v0 = vrot.slane %v1586_v5, 3  ;;  %v1596_v52 = vrot.slane %v1594_v39, 3  ;;  %v1841_v5 = vld [vmem:[#allocation2 + $0x4c8] sm:$0xff] }
  0xa9   : > { %1776 = vmatpush1.bf16.msra.mxu1 %v4628_v33  ;;  %1734 = vmatprep.subr.bf16.mxu0 %v4635_v13  ;;  %v4657_v33 = vld [vmem:[#allocation2 + $0x390] ss:$16 sps:$4 sm:$0xff]   ;;  %v4665_v13 = vld [vmem:[#allocation2 + $0x37c] ss:$16 sps:$4 sm:$0xff]   ;;  %v3552_v45 = vcombine.low %v1841_v5, %v1841_v5 }
  0xaa   : > { %1777 = vmatprep.subr.bf16.mxu1 %v4637_v49  ;;  %v4663_v49 = vld [vmem:[#allocation2 + $0x374] ss:$16 sps:$4 sm:$0xff]   ;;  %v1589_v43 = vor.u32 %v1588_v0, %v1585_v54  ;;  %v1597_v39 = vor.u32 %v1596_v52, %v1593_v6  ;;  %v4694_v54 = vld [vmem:[#allocation2 + $0x4ac] ss:$16 sps:$4 sm:$0xff]  }
  0xab   : > { %v4690_v52 = vsel %vm481_vm0, %v3552_v45, 0  ;;  %v4692_v0 = vld [vmem:[#allocation2 + $0x4a4] ss:$16 sps:$4 sm:$0xff]   ;;  %5515 = vst [vmem:[#allocation81_spill] sm:$0xff] %v4694_v54 }
  0xac   : > { %1735 = vmatpush1.bf16.msra.mxu0 %v4643_v50  ;;  %v4671_v50 = vld [vmem:[#allocation2 + $0x378] ss:$16 sps:$4 sm:$0xff]   ;;  %5513 = vst [vmem:[#allocation79_spill] sm:$0xff] %v4690_v52  ;;  %5514 = vst [vmem:[#allocation80_spill] sm:$0xff] %v4692_v0  ;;  %v4706_v45 = vld [vmem:[#allocation2 + $0x484] ss:$16 sps:$4 sm:$0xff]  }
  0xad   : > { %1778 = vmatpush1.bf16.msra.mxu1 %v4645_v26  ;;  %1736 = vmatprep.subr.bf16.mxu0 %v4651_v44  ;;  %v4669_v26 = vld [vmem:[#allocation2 + $0x370] ss:$16 sps:$4 sm:$0xff]   ;;  %v3550_v44 = vcombine.low %v1840_v38, %v1840_v38  ;;  %5518 = vst [vmem:[#allocation84_spill] sm:$0xff] %v4706_v45 }
  0xae   : > { %1779 = vmatprep.subr.bf16.mxu1 %v4653_v29  ;;  %v4677_v29 = vcombine.high %v1841_v5, %v1841_v5  ;;  %v4700_v38 = vld [vmem:[#allocation2 + $0x4a0] ss:$16 sps:$4 sm:$0xff]   ;;  %v4702_v5 = vld [vmem:[#allocation2 + $0x4a8] ss:$16 sps:$4 sm:$0xff]  }
  0xaf   : > { %v4687_v6 = vsel %vm481_vm0, %v3550_v44, 0  ;;  %5516 = vst [vmem:[#allocation82_spill] sm:$0xff] %v4700_v38  ;;  %5517 = vst [vmem:[#allocation83_spill] sm:$0xff] %v4702_v5  ;;  %v4708_v44 = vld [vmem:[#allocation2 + $0x48c] ss:$16 sps:$4 sm:$0xff]  }
  0xb0   : > { %1737 = vmatpush1.bf16.msra.mxu0 %v4657_v33  ;;  %5511 = vst [vmem:[#allocation77_spill] sm:$0xff] %v4677_v29  ;;  %5512 = vst [vmem:[#allocation78_spill] sm:$0xff] %v4687_v6 }
  0xb1   : > { %1780 = vmatpush1.bf16.msra.mxu1 %v4659_v46  ;;  %1738 = vmatprep.subr.bf16.mxu0 %v4663_v49  ;;  %v1598_v46 = vsel %vm1581_vm6, %v1589_v43, %v1597_v39  ;;  %5519 = vst [vmem:[#allocation85_spill] sm:$0xff] %v4708_v44  ;;  %v4716_v43 = vld [vmem:[#allocation2 + $0x488] ss:$16 sps:$4 sm:$0xff]   ;;  %v4720_v39 = vld [vmem:[#allocation2 + $0x464] ss:$16 sps:$4 sm:$0xff]  }
  0xb2   : > { %1781 = vmatprep.subr.bf16.mxu1 %v4665_v13  ;;  %5521 = vst [vmem:[#allocation87_spill] sm:$0xff] %v4716_v43  ;;  %5522 = vst [vmem:[#allocation88_spill] sm:$0xff] %v4720_v39 }
  0xb4   : > { %1739 = vmatpush1.bf16.msra.mxu0 %v4669_v26 }
  0xb5   : > { %1782 = vmatpush1.bf16.msra.mxu1 %v4671_v50  ;;  %3554 = vmatprep.subr.msk.bf16.mxu0 %vm481_vm0, %v4673_v42  ;;  %v1847_v42 = vrot.slane %v4631_v51, 3  ;;  %v4002_v51 = vld [vmem:[#allocation2 + $0x134] ss:$16 sps:$4 sm:$0xff]  }
  0xb6   : > { %3556 = vmatprep.subr.msk.bf16.mxu1 %vm481_vm0, %v4677_v29 }
  0xb7   : > { %3526 = vmatmul.mubr.msk.bf16.vlgmr.msra.gmra.mxu0 %vm477_vm2, %v1598_v46 }
  0xb8   : > { %3528 = vmatmul.mubr.msk.bf16.vlgmr.msra.gmra.mxu1 %vm477_vm2, %v1598_v46  ;;  %1979 = vmatpush1.bf16.msra.mxu0 %v4687_v6  ;;  %v4714_v46 = vld [vmem:[#allocation2 + $0x480] ss:$16 sps:$4 sm:$0xff]  }
  0xb9   : > { %2022 = vmatpush1.bf16.msra.mxu1 %v4690_v52  ;;  %1980 = vmatprep.subr.bf16.mxu0 %v4692_v0  ;;  %5520 = vst [vmem:[#allocation86_spill] sm:$0xff] %v4714_v46  ;;  %v1818_v0 = vld [vmem:[%s4256_s8] sm:$0x8]  ;;  %v4001_v52 = vld [vmem:[%s4256_s8 + $0x4] sm:$0xf] }
  0xba   : > { %2023 = vmatprep.subr.bf16.mxu1 %v4694_v54  ;;  %2006 = vmatprep.mubr.bf16.mxu0 %v5476_v53  ;;  %v4722_v54 = vld [vmem:[#allocation2 + $0x46c] ss:$16 sps:$4 sm:$0xff]   ;;  %v3529_v6 = vcombine.low %v1818_v0, %v4001_v52 }
  0xbb   : > { %2049 = vmatprep.mubr.bf16.mxu1 %v5476_v53  ;;  %5523 = vst [vmem:[#allocation89_spill] sm:$0xff] %v4722_v54  ;;  %v3558_v0 = vld [vmem:[%s4256_s8 + $0xc] sm:$0xf] }
  0xbc   : > { %1981 = vmatpush1.bf16.msra.mxu0 %v4700_v38  ;;  %v4726_v38 = vld [vmem:[#allocation2 + $0x460] ss:$16 sps:$4 sm:$0xff]   ;;  %v1846_v29 = vrot.slane %v3529_v6, 3  ;;  %v4003_v6 = vld [vmem:[#allocation2 + $0x13c] ss:$16 sps:$4 sm:$0xff]  }
  0xbd   : > { %2024 = vmatpush1.bf16.msra.mxu1 %v4702_v5  ;;  %1982 = vmatprep.subr.bf16.mxu0 %v4706_v45  ;;  %5524 = vst [vmem:[#allocation90_spill] sm:$0xff] %v4726_v38  ;;  %v4728_v5 = vld [vmem:[#allocation2 + $0x468] ss:$16 sps:$4 sm:$0xff]   ;;  %v4732_v45 = vld [vmem:[#allocation2 + $0x444] ss:$16 sps:$4 sm:$0xff]  }
  0xbe   : > { %2025 = vmatprep.subr.bf16.mxu1 %v4708_v44  ;;  %5525 = vst [vmem:[#allocation91_spill] sm:$0xff] %v4728_v5  ;;  %v4734_v44 = vld [vmem:[#allocation2 + $0x44c] ss:$16 sps:$4 sm:$0xff]   ;;  %v1848_v52 = vsel %vm1845_vm7, %v1846_v29, %v1847_v42  ;;  %v4772_v29 = vld [vmem:[%s4256_s8 + $0x10] sm:$0xf] }
  0xbf   : > { %5526 = vst [vmem:[#allocation92_spill] sm:$0xff] %v4734_v44  ;;  %v4007_v42 = vld [vmem:[#allocation2 + $0x11c] ss:$16 sps:$4 sm:$0xff]  }
  0xc0   : > { %1983 = vmatpush1.bf16.msra.mxu0 %v4714_v46  ;;  %v4739_v46 = vld [vmem:[#allocation2 + $0x440] ss:$16 sps:$4 sm:$0xff]  }
  0xc1   : > { %2026 = vmatpush1.bf16.msra.mxu1 %v4716_v43  ;;  %1984 = vmatprep.subr.bf16.mxu0 %v4720_v39  ;;  %5527 = vst [vmem:[#allocation93_spill] sm:$0xff] %v4739_v46  ;;  %v4741_v43 = vld [vmem:[#allocation2 + $0x448] ss:$16 sps:$4 sm:$0xff]   ;;  %v4748_v39 = vld [vmem:[#allocation2 + $0x42c] ss:$16 sps:$4 sm:$0xff]  }
  0xc2   : > { %2027 = vmatprep.subr.bf16.mxu1 %v4722_v54  ;;  %5528 = vst [vmem:[#allocation94_spill] sm:$0xff] %v4741_v43  ;;  %v4746_v54 = vld [vmem:[#allocation2 + $0x424] ss:$16 sps:$4 sm:$0xff]   ;;  %5530 = vst [vmem:[#allocation96_spill] sm:$0xff] %v4748_v39 }
  0xc3   : > { %5529 = vst [vmem:[#allocation95_spill] sm:$0xff] %v4746_v54 }
  0xc4   : > { %1985 = vmatpush1.bf16.msra.mxu0 %v4726_v38  ;;  %v4752_v38 = vld [vmem:[#allocation2 + $0x420] ss:$16 sps:$4 sm:$0xff]  }
  0xc5   : > { %2028 = vmatpush1.bf16.msra.mxu1 %v4728_v5  ;;  %1986 = vmatprep.subr.bf16.mxu0 %v4732_v45  ;;  %5531 = vst [vmem:[#allocation97_spill] sm:$0xff] %v4752_v38  ;;  %v4754_v5 = vld [vmem:[#allocation2 + $0x428] ss:$16 sps:$4 sm:$0xff]  }
  0xc6   : > { %2029 = vmatprep.subr.bf16.mxu1 %v4734_v44  ;;  %5532 = vst [vmem:[#allocation98_spill] sm:$0xff] %v4754_v5  ;;  %v4021_v44 = vld [vmem:[#allocation2 + $0xb8] ss:$16 sps:$4 sm:$0xff]  }
  0xc8   : > { %1987 = vmatpush1.bf16.msra.mxu0 %v4739_v46 }
  0xc9   : > { %2030 = vmatpush1.bf16.msra.mxu1 %v4741_v43  ;;  %1988 = vmatprep.subr.bf16.mxu0 %v4746_v54  ;;  %v4016_v54 = vld [vmem:[#allocation2 + $0xd0] ss:$16 sps:$4 sm:$0xff]   ;;  %v4017_v43 = vld [vmem:[#allocation2 + $0xd8] ss:$16 sps:$4 sm:$0xff]  }
  0xca   : > { %2031 = vmatprep.subr.bf16.mxu1 %v4748_v39 }
  0xcc   : > { %1989 = vmatpush1.bf16.msra.mxu0 %v4752_v38  ;;  %v4010_v38 = vld [vmem:[#allocation2 + $0xf4] ss:$16 sps:$4 sm:$0xff]  }
  0xcd   : > { %2032 = vmatpush1.bf16.msra.mxu1 %v4754_v5  ;;  %3563 = vmatprep.subr.msk.bf16.mxu0 %vm481_vm0, %v4237_v3  ;;  %v4004_v3 = vld [vmem:[#allocation2 + $0x130] ss:$16 sps:$4 sm:$0xff]  }
  0xce   : > { %3565 = vmatprep.subr.msk.bf16.mxu1 %vm481_vm0, %v4239_v4  ;;  %v4005_v4 = vld [vmem:[#allocation2 + $0x138] ss:$16 sps:$4 sm:$0xff]  }
  0xcf   : > { %3555 = vmatmul.mubr.msk.bf16.vlgmr.msra.gmra.mxu0 %vm477_vm2, %v1848_v52 }
  0xd0   : > { %3557 = vmatmul.mubr.msk.bf16.vlgmr.msra.gmra.mxu1 %vm477_vm2, %v1848_v52  ;;  %2196 = vmatpush1.bf16.msra.mxu0 %v4246_v9  ;;  %v4777_v9 = vcombine.low %v3558_v0, %v4772_v29  ;;  %v4008_v52 = vld [vmem:[#allocation2 + $0x110] ss:$16 sps:$4 sm:$0xff]   ;;  %v4013_v0 = vld [vmem:[#allocation2 + $0xf8] ss:$16 sps:$4 sm:$0xff]  }
  0xd1   : > { %2239 = vmatpush1.bf16.msra.mxu1 %v4249_v10  ;;  %2197 = vmatprep.subr.bf16.mxu0 %v4002_v51  ;;  %v4006_v10 = vld [vmem:[#allocation2 + $0x114] ss:$16 sps:$4 sm:$0xff]   ;;  %v4009_v51 = vld [vmem:[#allocation2 + $0x118] ss:$16 sps:$4 sm:$0xff]  }
  0xd2   : > { %2240 = vmatprep.subr.bf16.mxu1 %v4003_v6  ;;  %2223 = vmatprep.mubr.bf16.mxu0 %v5476_v53  ;;  %v4780_v6 = vld [vmem:[%s4256_s8 + $0x14] ss:$0 sps:$4 sm:$0x11]   ;;  %v2179_v5 = vshll.u32 %v4777_v9, 16 }
  0xd3   : > { %2266 = vmatprep.mubr.bf16.mxu1 %v5476_v53 }
  0xd4   : > { %2198 = vmatpush1.bf16.msra.mxu0 %v4004_v3  ;;  %v4011_v3 = vld [vmem:[#allocation2 + $0xfc] ss:$16 sps:$4 sm:$0xff]   ;;  %v2181_v39 = vrot.slane %v2179_v5, 1 }
  0xd5   : > { %2241 = vmatpush1.bf16.msra.mxu1 %v4005_v4  ;;  %2199 = vmatprep.subr.bf16.mxu0 %v4006_v10  ;;  %v4012_v4 = vld [vmem:[#allocation2 + $0xf0] ss:$16 sps:$4 sm:$0xff]   ;;  %v2177_v10 = vshrl.u32 %v4777_v9, 16 }
  0xd6   : > { %2242 = vmatprep.subr.bf16.mxu1 %v4007_v42  ;;  %v2184_v42 = vshll.u32 %v4780_v6, 16 }
  0xd8   : > { %2200 = vmatpush1.bf16.msra.mxu0 %v4008_v52  ;;  %v4014_v52 = vld [vmem:[#allocation2 + $0xd4] ss:$16 sps:$4 sm:$0xff]   ;;  %v2186_v46 = vrot.slane %v2184_v42, 1 }
  0xd9   : > { %2243 = vmatpush1.bf16.msra.mxu1 %v4009_v51  ;;  %2201 = vmatprep.subr.bf16.mxu0 %v4010_v38  ;;  %v4015_v51 = vld [vmem:[#allocation2 + $0xdc] ss:$16 sps:$4 sm:$0xff]   ;;  %v2182_v38 = vor.u32 %v2181_v39, %v2177_v10  ;;  %v4028_v39 = vld [vmem:[#allocation2 + $0x60] ss:$16 sps:$4 sm:$0xff]  }
  0xda   : > { %2244 = vmatprep.subr.bf16.mxu1 %v4011_v3  ;;  %v4018_v3 = vld [vmem:[#allocation2 + $0xb4] ss:$16 sps:$4 sm:$0xff]   ;;  %v5544_v10 = vld [vmem:[#allocation19_spill] sm:$0xff] }
  0xdb   : > { %v2187_v5 = vsel %vm354_vm1, %v2182_v38, %v2186_v46  ;;  %v4027_v46 = vld [vmem:[#allocation2 + $0x6c] ss:$16 sps:$4 sm:$0xff]  }
  0xdc   : > { %2202 = vmatpush1.bf16.msra.mxu0 %v4012_v4  ;;  %v4019_v4 = vld [vmem:[#allocation2 + $0xbc] ss:$16 sps:$4 sm:$0xff]  }
  0xdd   : > { %2245 = vmatpush1.bf16.msra.mxu1 %v4013_v0  ;;  %2203 = vmatprep.subr.bf16.mxu0 %v4014_v52  ;;  %v4020_v0 = vld [vmem:[#allocation2 + $0xb0] ss:$16 sps:$4 sm:$0xff]  }
  0xde   : > { %2246 = vmatprep.subr.bf16.mxu1 %v4015_v51  ;;  %v5545_v51 = vld [vmem:[#allocation20_spill] sm:$0xff]  ;;  %v5546_v38 = vld [vmem:[#allocation21_spill] sm:$0xff] }
  0xe0   : > { %2204 = vmatpush1.bf16.msra.mxu0 %v4016_v54  ;;  %v4022_v54 = vld [vmem:[#allocation2 + $0x84] ss:$16 sps:$4 sm:$0xff]  }
  0xe1   : > { %2247 = vmatpush1.bf16.msra.mxu1 %v4017_v43  ;;  %2205 = vmatprep.subr.bf16.mxu0 %v4018_v3  ;;  %v4023_v43 = vld [vmem:[#allocation2 + $0x8c] ss:$16 sps:$4 sm:$0xff]  }
  0xe2   : > { %2248 = vmatprep.subr.bf16.mxu1 %v4019_v4 }
  0xe4   : > { %2206 = vmatpush1.bf16.msra.mxu0 %v4020_v0 }
  0xe5   : > { %2249 = vmatpush1.bf16.msra.mxu1 %v4021_v44  ;;  %3567 = vmatprep.subr.msk.bf16.mxu0 %vm481_vm0, %v4271_v40  ;;  %v4024_v40 = vld [vmem:[#allocation2 + $0x80] ss:$16 sps:$4 sm:$0xff]   ;;  %v4025_v44 = vld [vmem:[#allocation2 + $0x88] ss:$16 sps:$4 sm:$0xff]  }
  0xe6   : > { %3569 = vmatprep.subr.msk.bf16.mxu1 %vm481_vm0, %v4273_v41  ;;  %v4026_v41 = vld [vmem:[#allocation2 + $0x64] ss:$16 sps:$4 sm:$0xff]  }
  0xe7   : > { %3564 = vmatmul.mubr.msk.bf16.vlgmr.msra.gmra.mxu0 %vm477_vm2, %v2187_v5 }
  0xe8   : > { %3566 = vmatmul.mubr.msk.bf16.vlgmr.msra.gmra.mxu1 %vm477_vm2, %v2187_v5  ;;  %2284 = vmatpush1.bf16.msra.mxu0 %v4281_v47 }
  0xe9   : > { %2327 = vmatpush1.bf16.msra.mxu1 %v4284_v48  ;;  %2285 = vmatprep.subr.bf16.mxu0 %v4022_v54  ;;  %v5547_v54 = vld [vmem:[#allocation22_spill] sm:$0xff] }
  0xea   : > { %2328 = vmatprep.subr.bf16.mxu1 %v4023_v43  ;;  %2311 = vmatprep.mubr.bf16.mxu0 %v5476_v53  ;;  %v5548_v43 = vld [vmem:[#allocation23_spill] sm:$0xff] }
  0xeb   : > { %2354 = vmatprep.mubr.bf16.mxu1 %v5476_v53 }
  0xec   : > { %2286 = vmatpush1.bf16.msra.mxu0 %v4024_v40  ;;  %v5549_v40 = vld [vmem:[#allocation24_spill] sm:$0xff] }
  0xed   : > { %2329 = vmatpush1.bf16.msra.mxu1 %v4025_v44  ;;  %2287 = vmatprep.subr.bf16.mxu0 %v4026_v41  ;;  %v5550_v44 = vld [vmem:[#allocation25_spill] sm:$0xff] }
  0xee   : > { %2330 = vmatprep.subr.bf16.mxu1 %v4027_v46 }
  0xf0   : > { %2288 = vmatpush1.bf16.msra.mxu0 %v4028_v39 }
  0xf1   : > { %2331 = vmatpush1.bf16.msra.mxu1 %v4292_v55  ;;  %2289 = vmatprep.subr.bf16.mxu0 %v4294_v56  ;;  %v3571_v55 = vld [vmem:[%s4256_s8 + $0xc] sm:$0xe] }
  0xf2   : > { %2332 = vmatprep.subr.bf16.mxu1 %v4296_v57  ;;  %v3572_v56 = vcombine.low %v3571_v55, %v4772_v29  ;;  %v5552_v55 = vld [vmem:[#allocation27_spill] sm:$0xff] }
  0xf4   : > { %2290 = vmatpush1.bf16.msra.mxu0 %v4298_v58  ;;  %v2474_v3 = vshrl.u32 %v3572_v56, 16  ;;  %v2477_v4 = vshll.u32 %v3572_v56, 16 }
  0xf5   : > { %2333 = vmatpush1.bf16.msra.mxu1 %v4301_v59  ;;  %2291 = vmatprep.subr.bf16.mxu0 %v4303_v60  ;;  %v2369_v59 = vrot.slane %v3572_v56, 1  ;;  %v2370_v60 = vrot.slane %v4780_v6, 1  ;;  %v5543_v6 = vld [vmem:[#allocation18_spill] sm:$0xff]  ;;  %v5553_v56 = vld [vmem:[#allocation28_spill] sm:$0xff] }
  0xf6   : > { %2334 = vmatprep.subr.bf16.mxu1 %v4307_v61  ;;  %v2476_v41 = vrot.slane %v2474_v3, 1  ;;  %v2479_v46 = vrot.slane %v2477_v4, 2  ;;  %v5572_v3 = vld [vmem:[#allocation47_spill] sm:$0xff]  ;;  %v5573_v4 = vld [vmem:[#allocation48_spill] sm:$0xff] }
  0xf8   : > { %2292 = vmatpush1.bf16.msra.mxu0 %v4309_v62 }
  0xf9   : > { %2335 = vmatpush1.bf16.msra.mxu1 %v4311_v63  ;;  %2293 = vmatprep.subr.bf16.mxu0 %v4315_v1  ;;  %v5533_v63 = vld [vmem:[#allocation8_spill] sm:$0xff]  ;;  %v5534_v1 = vld [vmem:[#allocation9_spill] sm:$0xff] }
  0xfa   : > { %2336 = vmatprep.subr.bf16.mxu1 %v4317_v2  ;;  %v2371_v2 = vsel %vm817_vm3, %v2369_v59, %v2370_v60  ;;  %v5554_v59 = vld [vmem:[#allocation29_spill] sm:$0xff]  ;;  %v5555_v60 = vld [vmem:[#allocation30_spill] sm:$0xff] }
  0xfc   : > { %2294 = vmatpush1.bf16.msra.mxu0 %v4323_v7 }
  0xfd   : > { %2337 = vmatpush1.bf16.msra.mxu1 %v4325_v8  ;;  %3573 = vmatprep.subr.msk.bf16.mxu0 %vm481_vm0, %v4327_v11  ;;  %v5535_v11 = vld [vmem:[#allocation10_spill] sm:$0xff] }
  0xfe   : > { %3575 = vmatprep.subr.msk.bf16.mxu1 %vm481_vm0, %v4331_v12  ;;  %v5536_v12 = vld [vmem:[#allocation11_spill] sm:$0xff] }
  0xff   : > { %3568 = vmatmul.mubr.msk.bf16.vlgmr.msra.gmra.mxu0 %vm477_vm2, %v4777_v9  ;;  %v528_v47 = vpop.f32.mrf.mxu0 }
 0x100   : > { %3570 = vmatmul.mubr.msk.bf16.vlgmr.msra.gmra.mxu1 %vm477_vm2, %v4777_v9  ;;  %2380 = vmatpush1.bf16.msra.mxu0 %v4342_v16  ;;  %v571_v48 = vpop.f32.mrf.mxu1 }
 0x101   : > { %2423 = vmatpush1.bf16.msra.mxu1 %v4345_v17  ;;  %2381 = vmatprep.subr.bf16.mxu0 %v4335_v15  ;;  %v530_v57 = vpop.f32.mrf.mxu0 }
 0x102   : > { %2424 = vmatprep.subr.bf16.mxu1 %v4347_v18  ;;  %2407 = vmatprep.mubr.bf16.mxu0 %v5476_v53  ;;  %v573_v58 = vpop.f32.mrf.mxu1 }
 0x103   : > { %2450 = vmatprep.mubr.bf16.mxu1 %v5476_v53  ;;  %v532_v61 = vpop.f32.mrf.mxu0 }
 0x104   : > { %2382 = vmatpush1.bf16.msra.mxu0 %v4355_v19  ;;  %v575_v62 = vpop.f32.mrf.mxu1  ;;  %v5537_v19 = vld [vmem:[#allocation12_spill] sm:$0xff] }
 0x105   : > { %2425 = vmatpush1.bf16.msra.mxu1 %v4357_v20  ;;  %2383 = vmatprep.subr.bf16.mxu0 %v4361_v21  ;;  %v534_v7 = vpop.f32.mrf.mxu0  ;;  %v5538_v20 = vld [vmem:[#allocation13_spill] sm:$0xff] }
 0x106   : > { %2426 = vmatprep.subr.bf16.mxu1 %v4363_v22  ;;  %v577_v8 = vpop.f32.mrf.mxu1 }
 0x108   : > { %2384 = vmatpush1.bf16.msra.mxu0 %v4369_v23  ;;  %v5539_v23 = vld [vmem:[#allocation14_spill] sm:$0xff] }
 0x109   : > { %2427 = vmatpush1.bf16.msra.mxu1 %v4371_v24  ;;  %2385 = vmatprep.subr.bf16.mxu0 %v4375_v25  ;;  %v5540_v24 = vld [vmem:[#allocation15_spill] sm:$0xff] }
 0x10a   : > { %2428 = vmatprep.subr.bf16.mxu1 %v4377_v27 }
 0x10c   : > { %2386 = vmatpush1.bf16.msra.mxu0 %v4379_v28 }
 0x10d   : > { %2429 = vmatpush1.bf16.msra.mxu1 %v4383_v30  ;;  %2387 = vmatprep.subr.bf16.mxu0 %v4385_v31 }
 0x10e   : > { %2430 = vmatprep.subr.bf16.mxu1 %v4387_v32 }
 0x110   : > { %2388 = vmatpush1.bf16.msra.mxu0 %v4392_v34  ;;  %v5541_v34 = vld [vmem:[#allocation16_spill] sm:$0xff] }
 0x111   : > { %2431 = vmatpush1.bf16.msra.mxu1 %v4394_v35  ;;  %2389 = vmatprep.subr.bf16.mxu0 %v4396_v36  ;;  %v5542_v35 = vld [vmem:[#allocation17_spill] sm:$0xff]  ;;  %v4860_v36 = vld [vmem:[%s4256_s8 + $0x14] ss:$0 sps:$4 sm:$0x33]  }
 0x112   : > { %2432 = vmatprep.subr.bf16.mxu1 %v4400_v37  ;;  %v2482_v0 = vshrl.u32 %v4860_v36, 16  ;;  %v2485_v5 = vshll.u32 %v4860_v36, 16 }
 0x114   : > { %2390 = vmatpush1.bf16.msra.mxu0 %v5533_v63  ;;  %v2484_v39 = vrot.slane %v2482_v0, 1 }
 0x115   : > { %2433 = vmatpush1.bf16.msra.mxu1 %v5534_v1  ;;  %3579 = vmatprep.subr.msk.bf16.mxu0 %vm481_vm0, %v5535_v11  ;;  %v5558_v1 = vld [vmem:[#allocation33_spill] sm:$0xff] }
 0x116   : > { %3581 = vmatprep.subr.msk.bf16.mxu1 %vm481_vm0, %v5536_v12  ;;  %v5560_v12 = vld [vmem:[#allocation36_spill] sm:$0xff] }
 0x117   : > { %v738_v15 = vpop.f32.mrf.mxu0  ;;  %3574 = vmatmul.mubr.msk.bf16.vlgmr.msra.gmra.mxu0 %vm477_vm2, %v2371_v2 }
 0x118   : > { %v781_v16 = vpop.f32.mrf.mxu1  ;;  %3576 = vmatmul.mubr.msk.bf16.vlgmr.msra.gmra.mxu1 %vm477_vm2, %v2371_v2  ;;  %v739_v17 = vadd.f32 %v738_v15, %v528_v47  ;;  %2498 = vmatpush1.bf16.msra.mxu0 %v5537_v19  ;;  %v2487_v47 = vrot.slane %v2485_v5, 2  ;;  %v5561_v15 = vld [vmem:[#allocation37_spill] sm:$0xff] }
 0x119   : > { %v782_v18 = vadd.f32 %v781_v16, %v571_v48  ;;  %2541 = vmatpush1.bf16.msra.mxu1 %v5538_v20  ;;  %v740_v21 = vpop.f32.mrf.mxu0  ;;  %2499 = vmatprep.subr.bf16.mxu0 %v5539_v23  ;;  %v5551_v48 = vld [vmem:[#allocation26_spill] sm:$0xff]  ;;  %v5562_v20 = vld [vmem:[#allocation35_spill] sm:$0xff]  ;;  %v5574_v5 = vld [vmem:[#allocation49_spill] sm:$0xff] }
 0x11a   : > { %v783_v22 = vpop.f32.mrf.mxu1  ;;  %2542 = vmatprep.subr.bf16.mxu1 %v5540_v24  ;;  %v741_v25 = vadd.f32 %v740_v21, %v530_v57  ;;  %2525 = vmatprep.mubr.bf16.mxu0 %v5476_v53  ;;  %v2480_v57 = vor.u32 %v2479_v46, %v2476_v41  ;;  %v5563_v21 = vld [vmem:[#allocation38_spill] sm:$0xff]  ;;  %v5580_v46 = vld [vmem:[#allocation55_spill] sm:$0xff] }
 0x11b   : > { %v784_v27 = vadd.f32 %v783_v22, %v573_v58  ;;  %2568 = vmatprep.mubr.bf16.mxu1 %v5476_v53  ;;  %v742_v28 = vpop.f32.mrf.mxu0  ;;  %v2488_v58 = vor.u32 %v2487_v47, %v2484_v39  ;;  %v5579_v41 = vld [vmem:[#allocation54_spill] sm:$0xff]  ;;  %v5581_v39 = vld [vmem:[#allocation56_spill] sm:$0xff] }
 0x11c   : > { %v785_v30 = vpop.f32.mrf.mxu1  ;;  %v743_v31 = vadd.f32 %v742_v28, %v532_v61  ;;  %2500 = vmatpush1.bf16.msra.mxu0 %v5541_v34  ;;  %v5556_v61 = vld [vmem:[#allocation31_spill] sm:$0xff]  ;;  %v5565_v34 = vld [vmem:[#allocation40_spill] sm:$0xff] }
 0x11d   : > { %v786_v32 = vadd.f32 %v785_v30, %v575_v62  ;;  %2543 = vmatpush1.bf16.msra.mxu1 %v5542_v35  ;;  %v744_v37 = vpop.f32.mrf.mxu0  ;;  %2501 = vmatprep.subr.bf16.mxu0 %v5543_v6  ;;  %v5557_v62 = vld [vmem:[#allocation32_spill] sm:$0xff]  ;;  %v2489_v63 = vsel %vm1067_vm4, %v2480_v57, %v2488_v58  ;;  %v5564_v30 = vld [vmem:[#allocation39_spill] sm:$0xff]  ;;  %v5567_v6 = vld [vmem:[#allocation42_spill] sm:$0xff] }
 0x11e   : > { %v787_v9 = vpop.f32.mrf.mxu1  ;;  %2544 = vmatprep.subr.bf16.mxu1 %v5544_v10  ;;  %v745_v42 = vadd.f32 %v744_v37, %v534_v7  ;;  %v5568_v10 = vld [vmem:[#allocation43_spill] sm:$0xff] }
 0x11f   : > { %v788_v52 = vadd.f32 %v787_v9, %v577_v8  ;;  %v5566_v9 = vld [vmem:[#allocation41_spill] sm:$0xff] }
 0x120   : > { %2502 = vmatpush1.bf16.msra.mxu0 %v5545_v51  ;;  %v5569_v51 = vld [vmem:[#allocation44_spill] sm:$0xff] }
 0x121   : > { %2545 = vmatpush1.bf16.msra.mxu1 %v5546_v38  ;;  %2503 = vmatprep.subr.bf16.mxu0 %v5547_v54  ;;  %v5570_v38 = vld [vmem:[#allocation45_spill] sm:$0xff]  ;;  %v5575_v54 = vld [vmem:[#allocation50_spill] sm:$0xff] }
 0x122   : > { %2546 = vmatprep.subr.bf16.mxu1 %v5548_v43 }
 0x124   : > { %2504 = vmatpush1.bf16.msra.mxu0 %v5549_v40  ;;  %v2592_v40 = vrot.slane %v4860_v36, 2 }
 0x125   : > { %2547 = vmatpush1.bf16.msra.mxu1 %v5550_v44  ;;  %2505 = vmatprep.subr.bf16.mxu0 %v4472_v14  ;;  %v5559_v14 = vld [vmem:[#allocation34_spill] sm:$0xff]  ;;  %v5578_v44 = vld [vmem:[#allocation53_spill] sm:$0xff] }
 0x126   : > { %2548 = vmatprep.subr.bf16.mxu1 %v5551_v48  ;;  %v5582_v48 = vld [vmem:[#allocation57_spill] sm:$0xff] }
 0x128   : > { %2506 = vmatpush1.bf16.msra.mxu0 %v5552_v55  ;;  %v5583_v55 = vld [vmem:[#allocation58_spill] sm:$0xff] }
 0x129   : > { %2549 = vmatpush1.bf16.msra.mxu1 %v5553_v56  ;;  %2507 = vmatprep.subr.bf16.mxu0 %v5554_v59  ;;  %v5584_v59 = vld [vmem:[#allocation59_spill] sm:$0xff] }
 0x12a   : > { %2550 = vmatprep.subr.bf16.mxu1 %v5555_v60  ;;  %v5585_v60 = vld [vmem:[#allocation60_spill] sm:$0xff] }
 0x12c   : > { %2508 = vmatpush1.bf16.msra.mxu0 %v5556_v61 }
 0x12d   : > { %2551 = vmatpush1.bf16.msra.mxu1 %v5557_v62  ;;  %3585 = vmatprep.subr.msk.bf16.mxu0 %vm481_vm0, %v5558_v1  ;;  %v5587_v1 = vld [vmem:[#allocation62_spill] sm:$0xff] }
 0x12e   : > { %3587 = vmatprep.subr.msk.bf16.mxu1 %vm481_vm0, %v5559_v14 }
 0x12f   : > { %v980_v2 = vpop.f32.mrf.mxu0  ;;  %3580 = vmatmul.mubr.msk.bf16.vlgmr.msra.gmra.mxu0 %vm477_vm2, %v2489_v63 }
 0x130   : > { %v1023_v7 = vpop.f32.mrf.mxu1  ;;  %3582 = vmatmul.mubr.msk.bf16.vlgmr.msra.gmra.mxu1 %vm477_vm2, %v2489_v63  ;;  %v1032_v8 = vadd.f32 %v980_v2, %v739_v17  ;;  %2602 = vmatpush1.bf16.msra.mxu0 %v5560_v12  ;;  %v5586_v63 = vld [vmem:[#allocation61_spill] sm:$0xff] }
 0x131   : > { %v1034_v11 = vadd.f32 %v1023_v7, %v782_v18  ;;  %2645 = vmatpush1.bf16.msra.mxu1 %v5561_v15  ;;  %v982_v16 = vpop.f32.mrf.mxu0  ;;  %2603 = vmatprep.subr.bf16.mxu0 %v5562_v20  ;;  %v5588_v15 = vld [vmem:[#allocation63_spill] sm:$0xff] }
 0x132   : > { %v1025_v19 = vpop.f32.mrf.mxu1  ;;  %2646 = vmatprep.subr.bf16.mxu1 %v5563_v21  ;;  %v1033_v22 = vadd.f32 %v982_v16, %v741_v25  ;;  %2629 = vmatprep.mubr.bf16.mxu0 %v5476_v53  ;;  %v5589_v16 = vld [vmem:[#allocation64_spill] sm:$0xff] }
 0x133   : > { %v1035_v23 = vadd.f32 %v1025_v19, %v784_v27  ;;  %2672 = vmatprep.mubr.bf16.mxu1 %v5476_v53  ;;  %v984_v24 = vpop.f32.mrf.mxu0  ;;  %v4930_v19 = vld [vmem:[%s4256_s8 + $0x14] ss:$0 sps:$4 sm:$0x77]  }
 0x134   : > { %v1027_v17 = vpop.f32.mrf.mxu1  ;;  %v1036_v18 = vadd.f32 %v984_v24, %v743_v31  ;;  %2604 = vmatpush1.bf16.msra.mxu0 %v5564_v30  ;;  %v5571_v31 = vld [vmem:[#allocation46_spill] sm:$0xff]  ;;  %v5590_v24 = vld [vmem:[#allocation65_spill] sm:$0xff]  ;;  %v5592_v30 = vld [vmem:[#allocation67_spill] sm:$0xff] }
 0x135   : > { %v1038_v28 = vadd.f32 %v1027_v17, %v786_v32  ;;  %2647 = vmatpush1.bf16.msra.mxu1 %v5565_v34  ;;  %v986_v35 = vpop.f32.mrf.mxu0  ;;  %2605 = vmatprep.subr.bf16.mxu0 %v5566_v9  ;;  %v3583_v32 = vld [vmem:[%s4256_s8 + $0xc] sm:$0xc]  ;;  %v5593_v34 = vld [vmem:[#allocation68_spill] sm:$0xff]  ;;  %v5594_v9 = vld [vmem:[#allocation69_spill] sm:$0xff] }
 0x136   : > { %v1029_v37 = vpop.f32.mrf.mxu1  ;;  %2648 = vmatprep.subr.bf16.mxu1 %v5567_v6  ;;  %v1037_v25 = vadd.f32 %v986_v35, %v745_v42  ;;  %v3584_v0 = vcombine.low %v3583_v32, %v4772_v29  ;;  %v5576_v42 = vld [vmem:[#allocation51_spill] sm:$0xff]  ;;  %v2704_v35 = vshrl.u32 %v4930_v19, 16  ;;  %v5595_v6 = vld [vmem:[#allocation70_spill] sm:$0xff]  ;;  %v5598_v32 = vld [vmem:[#allocation73_spill] sm:$0xff] }
 0x137   : > { %v1039_v27 = vadd.f32 %v1029_v37, %v788_v52  ;;  %v5577_v52 = vld [vmem:[#allocation52_spill] sm:$0xff]  ;;  %v2707_v37 = vshll.u32 %v4930_v19, 16 }
 0x138   : > { %2606 = vmatpush1.bf16.msra.mxu0 %v5568_v10  ;;  %v2591_v43 = vrot.slane %v3584_v0, 2  ;;  %v5596_v10 = vld [vmem:[#allocation71_spill] sm:$0xff] }
 0x139   : > { %2649 = vmatpush1.bf16.msra.mxu1 %v5569_v51  ;;  %2607 = vmatprep.subr.bf16.mxu0 %v5570_v38  ;;  %v5597_v51 = vld [vmem:[#allocation72_spill] sm:$0xff]  ;;  %v2706_v38 = vrot.slane %v2704_v35, 2 }
 0x13a   : > { %2650 = vmatprep.subr.bf16.mxu1 %v5571_v31  ;;  %v2593_v47 = vsel %vm1331_vm5, %v2591_v43, %v2592_v40  ;;  %v2709_v31 = vrot.slane %v2707_v37, 3  ;;  %v5603_v40 = vld [vmem:[#allocation78_spill] sm:$0xff] }
 0x13c   : > { %2608 = vmatpush1.bf16.msra.mxu0 %v5572_v3  ;;  %v5599_v3 = vld [vmem:[#allocation74_spill] sm:$0xff] }
 0x13d   : > { %2651 = vmatpush1.bf16.msra.mxu1 %v5573_v4  ;;  %2609 = vmatprep.subr.bf16.mxu0 %v5574_v5  ;;  %v5600_v4 = vld [vmem:[#allocation75_spill] sm:$0xff]  ;;  %v2710_v5 = vor.u32 %v2709_v31, %v2706_v38  ;;  %v2070_v38 = vlaneseq }
 0x13e   : > { %2652 = vmatprep.subr.bf16.mxu1 %v5575_v54 }
 0x13f   : > { %v2071_v31 = vshrl.u32 %v2070_v38, 7  ;;  %v3001_v38 = vld [vmem:[%s5319_s4 + $0xf8] sm:$0xff] }
 0x140   : > { %2610 = vmatpush1.bf16.msra.mxu0 %v5576_v42  ;;  %v5601_v42 = vld [vmem:[#allocation76_spill] sm:$0xff] }
 0x141   : > { %2653 = vmatpush1.bf16.msra.mxu1 %v5577_v52  ;;  %2611 = vmatprep.subr.bf16.mxu0 %v5578_v44  ;;  %v5602_v52 = vld [vmem:[#allocation77_spill] sm:$0xff] }
 0x142   : > { %2654 = vmatprep.subr.bf16.mxu1 %v5579_v41  ;;  %v5605_v41 = vld [vmem:[#allocation80_spill] sm:$0xff] }
 0x144   : > { %2612 = vmatpush1.bf16.msra.mxu0 %v5580_v46  ;;  %v5606_v46 = vld [vmem:[#allocation81_spill] sm:$0xff] }
 0x145   : > { %2655 = vmatpush1.bf16.msra.mxu1 %v5581_v39  ;;  %3591 = vmatprep.subr.msk.bf16.mxu0 %vm481_vm0, %v5582_v48 }
 0x146   : > { %3593 = vmatprep.subr.msk.bf16.mxu1 %vm481_vm0, %v5583_v55 }
 0x147   : > { %v1244_v56 = vpop.f32.mrf.mxu0  ;;  %3586 = vmatmul.mubr.msk.bf16.vlgmr.msra.gmra.mxu0 %vm477_vm2, %v2593_v47 }
 0x148   : > { %v1287_v57 = vpop.f32.mrf.mxu1  ;;  %3588 = vmatmul.mubr.msk.bf16.vlgmr.msra.gmra.mxu1 %vm477_vm2, %v2593_v47  ;;  %v1296_v36 = vadd.f32 %v1244_v56, %v1032_v8  ;;  %2720 = vmatpush1.bf16.msra.mxu0 %v5584_v59 }
 0x149   : > { %v1298_v58 = vadd.f32 %v1287_v57, %v1034_v11  ;;  %2763 = vmatpush1.bf16.msra.mxu1 %v5585_v60  ;;  %v1246_v61 = vpop.f32.mrf.mxu0  ;;  %2721 = vmatprep.subr.bf16.mxu0 %v5586_v63 }
 0x14a   : > { %v1289_v62 = vpop.f32.mrf.mxu1  ;;  %2764 = vmatprep.subr.bf16.mxu1 %v5587_v1  ;;  %v1297_v14 = vadd.f32 %v1246_v61, %v1033_v22  ;;  %2747 = vmatprep.mubr.bf16.mxu0 %v5476_v53  ;;  %v5591_v22 = vld [vmem:[#allocation66_spill] sm:$0xff]  ;;  %v5609_v61 = vld [vmem:[#allocation84_spill] sm:$0xff] }
 0x14b   : > { %v1299_v2 = vadd.f32 %v1289_v62, %v1035_v23  ;;  %2790 = vmatprep.mubr.bf16.mxu1 %v5476_v53  ;;  %v1248_v7 = vpop.f32.mrf.mxu0  ;;  %v5610_v62 = vld [vmem:[#allocation85_spill] sm:$0xff] }
 0x14c   : > { %v1291_v8 = vpop.f32.mrf.mxu1  ;;  %v1300_v11 = vadd.f32 %v1248_v7, %v1036_v18  ;;  %2722 = vmatpush1.bf16.msra.mxu0 %v5588_v15  ;;  %v2696_v18 = vshrl.u32 %v3584_v0, 16  ;;  %v5614_v7 = vld [vmem:[#allocation89_spill] sm:$0xff] }
 0x14d   : > { %v1302_v12 = vadd.f32 %v1291_v8, %v1038_v28  ;;  %2765 = vmatpush1.bf16.msra.mxu1 %v5589_v16  ;;  %v1250_v20 = vpop.f32.mrf.mxu0  ;;  %2723 = vmatprep.subr.bf16.mxu0 %v5590_v24  ;;  %v2699_v28 = vshll.u32 %v3584_v0, 16  ;;  %v3595_v8 = vld [vmem:[%s4256_s8 + $0xc] sm:$0x8]  ;;  %v5617_v16 = vld [vmem:[#allocation92_spill] sm:$0xff]  ;;  %s4061_s8 = scalar_lea.vmem %s4060_s29, 64 }
 0x14e   : > { %v1293_v21 = vpop.f32.mrf.mxu1  ;;  %2766 = vmatprep.subr.bf16.mxu1 %v5591_v22  ;;  %v1301_v23 = vadd.f32 %v1250_v20, %v1037_v25  ;;  %v2698_v25 = vrot.slane %v2696_v18, 2  ;;  %v3596_v15 = vcombine.low %v3595_v8, %v4772_v29  ;;  %v5618_v20 = vld [vmem:[#allocation93_spill] sm:$0xff]  ;;  %v2814_v22 = vrot.slane %v4930_v19, 3  ;;  %p4063_p12 = scmp.lt.s32.totalorder %s4061_s8, %s4055_s23 }
 0x14f   : > { %v1303_v17 = vadd.f32 %v1293_v21, %v1039_v27  ;;  %v2701_v27 = vrot.slane %v2699_v28, 3  ;;  %v5619_v21 = vld [vmem:[#allocation94_spill] sm:$0xff] }
 0x150   : > { %2724 = vmatpush1.bf16.msra.mxu0 %v5592_v30  ;;  %v2813_v24 = vrot.slane %v3596_v15, 3  ;;  %v5622_v30 = vld [vmem:[#allocation97_spill] sm:$0xff]  ;;  %p4064_p13 = por %p4063_p12, %p4062_p11 }
 0x151   : > { %2767 = vmatpush1.bf16.msra.mxu1 %v5593_v34  ;;  %2725 = vmatprep.subr.bf16.mxu0 %v5594_v9  ;;  %v2702_v0 = vor.u32 %v2701_v27, %v2698_v25  ;;  %v5623_v34 = vld [vmem:[#allocation98_spill] sm:$0xff] }
 0x152   : > { %2768 = vmatprep.subr.bf16.mxu1 %v5595_v6  ;;  %v2815_v29 = vsel %vm1845_vm7, %v2813_v24, %v2814_v22  ;;  %p4065_p0 = pnand %p4064_p13, %p4058_p10 }
 0x153   : > { %v2711_v54 = vsel %vm1581_vm6, %v2702_v0, %v2710_v5  ;;  %v2076_v0 = vsub.s32 1, %v2071_v31  ;;  %v2084_v5 = vsub.s32 3, %v2071_v31 }
 0x154   : > { %2726 = vmatpush1.bf16.msra.mxu0 %v5596_v10 }
 0x155   : > { %2769 = vmatpush1.bf16.msra.mxu1 %v5597_v51  ;;  %2727 = vmatprep.subr.bf16.mxu0 %v5598_v32  ;;  %v2072_v32 = vsub.s32 0, %v2071_v31 }
 0x156   : > { %2770 = vmatprep.subr.bf16.mxu1 %v5599_v3  ;;  %v2080_v3 = vsub.s32 2, %v2071_v31  ;;  %v3033_v31 = vld [vmem:[%s5319_s4 + $0x1f8] sm:$0xff] }
 0x158   : > { %2728 = vmatpush1.bf16.msra.mxu0 %v4657_v33 }
 0x159   : > { %2771 = vmatpush1.bf16.msra.mxu1 %v5600_v4  ;;  %2729 = vmatprep.subr.bf16.mxu0 %v4663_v49  ;;  %v2068_v4 = vld [vmem:[%s5317_s2] sm:$0xf] }
 0x15a   : > { %2772 = vmatprep.subr.bf16.mxu1 %v4665_v13 }
 0x15c   : > { %2730 = vmatpush1.bf16.msra.mxu0 %v4669_v26  ;;  %v5604_v26 = vld [vmem:[#allocation79_spill] sm:$0xff] }
 0x15d   : > { %2773 = vmatpush1.bf16.msra.mxu1 %v4671_v50  ;;  %3597 = vmatprep.subr.msk.bf16.mxu0 %vm481_vm0, %v5601_v42 }
 0x15e   : > { %3599 = vmatprep.subr.msk.bf16.mxu1 %vm481_vm0, %v5602_v52  ;;  %v4994_v52 = vrot.slane %v2068_v4, %v2072_v32 }
 0x15f   : > { %v1494_v33 = vpop.f32.mrf.mxu0  ;;  %3592 = vmatmul.mubr.msk.bf16.vlgmr.msra.gmra.mxu0 %vm477_vm2, %v2711_v54 }
 0x160   : > { %v1537_v43 = vpop.f32.mrf.mxu1  ;;  %3594 = vmatmul.mubr.msk.bf16.vlgmr.msra.gmra.mxu1 %vm477_vm2, %v2711_v54  ;;  %v1546_v49 = vadd.f32 %v1494_v33, %v1296_v36  ;;  %2824 = vmatpush1.bf16.msra.mxu0 %v5603_v40  ;;  %v5607_v36 = vld [vmem:[#allocation82_spill] sm:$0xff]  ;;  %5624 = vst [vmem:[#allocation8_spill] sm:$0xff] %v4994_v52  ;;  %v2098_v33 = vld [vmem:[%s5318_s3] sm:$0xf] }
 0x161   : > { %v1548_v13 = vadd.f32 %v1537_v43, %v1298_v58  ;;  %2867 = vmatpush1.bf16.msra.mxu1 %v5604_v26  ;;  %v1496_v50 = vpop.f32.mrf.mxu0  ;;  %2825 = vmatprep.subr.bf16.mxu0 %v5605_v41  ;;  %v5608_v58 = vld [vmem:[#allocation83_spill] sm:$0xff]  ;;  %v4999_v43 = vrot.slane %v2068_v4, %v2080_v3  ;;  %v5005_v41 = vrot.slane %v2098_v33, %v2072_v32  ;;  %v2985_v32 = vld [vmem:[%s5319_s4 + $0x78] sm:$0xff] }
 0x162   : > { %v1539_v44 = vpop.f32.mrf.mxu1  ;;  %2868 = vmatprep.subr.bf16.mxu1 %v5606_v46  ;;  %v1547_v39 = vadd.f32 %v1496_v50, %v1297_v14  ;;  %2851 = vmatprep.mubr.bf16.mxu0 %v5476_v53  ;;  %v5612_v14 = vld [vmem:[#allocation87_spill] sm:$0xff]  ;;  %v5001_v50 = vrot.slane %v2068_v4, %v2076_v0  ;;  %v5007_v46 = vrot.slane %v2098_v33, %v2080_v3  ;;  %v3017_v3 = vld [vmem:[%s5319_s4 + $0x178] sm:$0xff] }
 0x163   : > { %v1549_v47 = vadd.f32 %v1539_v44, %v1299_v2  ;;  %2894 = vmatprep.mubr.bf16.mxu1 %v5476_v53  ;;  %v1498_v48 = vpop.f32.mrf.mxu0  ;;  %v5611_v53 = vld [vmem:[#allocation86_spill] sm:$0xff]  ;;  %v5613_v2 = vld [vmem:[#allocation88_spill] sm:$0xff]  ;;  %5625 = vst [vmem:[#allocation9_spill] sm:$0xff] %v4999_v43  ;;  %v5003_v44 = vrot.slane %v2068_v4, %v2084_v5  ;;  %5628 = vst [vmem:[#allocation12_spill] sm:$0xff] %v5005_v41 }
 0x164   : > { %v1541_v55 = vpop.f32.mrf.mxu1  ;;  %v1550_v56 = vadd.f32 %v1498_v48, %v1300_v11  ;;  %2826 = vmatpush1.bf16.msra.mxu0 %v5607_v36  ;;  %v5615_v11 = vld [vmem:[#allocation90_spill] sm:$0xff]  ;;  %5626 = vst [vmem:[#allocation10_spill] sm:$0xff] %v5001_v50  ;;  %5629 = vst [vmem:[#allocation13_spill] sm:$0xff] %v5007_v46  ;;  %v3000_v4 = vld [vmem:[%s5319_s4 + $0xf0] sm:$0xff] }
 0x165   : > { %v1552_v57 = vadd.f32 %v1541_v55, %v1302_v12  ;;  %2869 = vmatpush1.bf16.msra.mxu1 %v5608_v58  ;;  %v1500_v59 = vpop.f32.mrf.mxu0  ;;  %2827 = vmatprep.subr.bf16.mxu0 %v5609_v61  ;;  %v5616_v12 = vld [vmem:[#allocation91_spill] sm:$0xff]  ;;  %5627 = vst [vmem:[#allocation11_spill] sm:$0xff] %v5003_v44 }
 0x166   : > { %v1543_v60 = vpop.f32.mrf.mxu1  ;;  %2870 = vmatprep.subr.bf16.mxu1 %v5610_v62  ;;  %v4967_v63 = vadd.f32 %v1500_v59, %v1301_v23  ;;  %v5620_v23 = vld [vmem:[#allocation95_spill] sm:$0xff]  ;;  %v5015_v62 = vrot.slane %v2098_v33, %v2084_v5 }
 0x167   : > { %v4969_v1 = vadd.f32 %v1543_v60, %v1303_v17  ;;  %v5621_v17 = vld [vmem:[#allocation96_spill] sm:$0xff]  ;;  %v5012_v60 = vrot.slane %v2098_v33, %v2076_v0  ;;  %v3031_v33 = vld [vmem:[%s5319_s4 + $0x1e8] sm:$0xff] }
 0x168   : > { %2828 = vmatpush1.bf16.msra.mxu0 %v5611_v53  ;;  %5631 = vst [vmem:[#allocation15_spill] sm:$0xff] %v5015_v62  ;;  %v3032_v0 = vld [vmem:[%s5319_s4 + $0x1f0] sm:$0xff] }
 0x169   : > { %2871 = vmatpush1.bf16.msra.mxu1 %v5612_v14  ;;  %2829 = vmatprep.subr.bf16.mxu0 %v5613_v2  ;;  %5630 = vst [vmem:[#allocation14_spill] sm:$0xff] %v5012_v60  ;;  %v2984_v5 = vld [vmem:[%s5319_s4 + $0x70] sm:$0xff] }
 0x16a   : > { %2872 = vmatprep.subr.bf16.mxu1 %v5614_v7 }
 0x16c   : > { %2830 = vmatpush1.bf16.msra.mxu0 %v5615_v11 }
 0x16d   : > { %2873 = vmatpush1.bf16.msra.mxu1 %v5616_v12  ;;  %2831 = vmatprep.subr.bf16.mxu0 %v4732_v45 }
 0x16e   : > { %2874 = vmatprep.subr.bf16.mxu1 %v5617_v16 }
 0x170   : > { %2832 = vmatpush1.bf16.msra.mxu0 %v5618_v20 }
 0x171   : > { %2875 = vmatpush1.bf16.msra.mxu1 %v5619_v21  ;;  %2833 = vmatprep.subr.bf16.mxu0 %v5620_v23 }
 0x172   : > { %2876 = vmatprep.subr.bf16.mxu1 %v5621_v17 }
 0x174   : > { %2834 = vmatpush1.bf16.msra.mxu0 %v5622_v30 }
 0x175   : > { %2877 = vmatpush1.bf16.msra.mxu1 %v5623_v34  ;;  %3607 = vmatprep.subr.mxu0 %v3001_v38  ;;  %v2988_v38 = vld [vmem:[%s5319_s4 + $0x90] sm:$0xff] }
 0x176   : > { %3642 = vmatprep.subr.mxu1 %v3033_v31  ;;  %v3020_v31 = vld [vmem:[%s5319_s4 + $0x190] sm:$0xff] }
 0x177   : > { %v1758_v45 = vpop.f32.mrf.mxu0  ;;  %3598 = vmatmul.mubr.msk.bf16.vlgmr.msra.gmra.mxu0 %vm477_vm2, %v2815_v29 }
 0x178   : > { %v1801_v18 = vpop.f32.mrf.mxu1  ;;  %3600 = vmatmul.mubr.msk.bf16.vlgmr.msra.gmra.mxu1 %vm477_vm2, %v2815_v29  ;;  %v1810_v28 = vadd.f32 %v1758_v45, %v1546_v49  ;;  %3608 = vmatpush3.msra.mxu0 %v2985_v32  ;;  %v2972_v32 = vld [vmem:[%s5319_s4 + $0x10] sm:$0xff] }
 0x179   : > { %v1812_v35 = vadd.f32 %v1801_v18, %v1548_v13  ;;  %v1760_v37 = vpop.f32.mrf.mxu0  ;;  %3643 = vmatpush3.msra.mxu1 %v3017_v3  ;;  %3609 = vmatprep.subr.mxu0 %v3000_v4  ;;  %v3004_v3 = vld [vmem:[%s5319_s4 + $0x110] sm:$0xff]  ;;  %v2987_v4 = vld [vmem:[%s5319_s4 + $0x88] sm:$0xff] }
 0x17a   : > { %v1803_v19 = vpop.f32.mrf.mxu1  ;;  %v1811_v9 = vadd.f32 %v1760_v37, %v1547_v39  ;;  %3644 = vmatprep.subr.mxu1 %v3032_v0  ;;  %3610 = vmatpush3.msra.mxu0 %v2984_v5  ;;  %v3019_v0 = vld [vmem:[%s5319_s4 + $0x188] sm:$0xff] }
 0x17b   : > { %v1813_v6 = vadd.f32 %v1803_v19, %v1549_v47  ;;  %v1762_v10 = vpop.f32.mrf.mxu0  ;;  %v2971_v5 = vld [vmem:[%s5319_s4 + $0x8] sm:$0xff] }
 0x17c   : > { %v1805_v51 = vpop.f32.mrf.mxu1  ;;  %v1814_v25 = vadd.f32 %v1762_v10, %v1550_v56 }
 0x17d   : > { %v1816_v27 = vadd.f32 %v1805_v51, %v1552_v57  ;;  %v1764_v54 = vpop.f32.mrf.mxu0 }
 0x17e   : > { %v1807_v42 = vpop.f32.mrf.mxu1  ;;  %v1815_v53 = vadd.f32 %v1764_v54, %v4967_v63  ;;  %v3016_v54 = vld [vmem:[%s5319_s4 + $0x170] sm:$0xff] }
 0x17f   : > { %v1817_v14 = vadd.f32 %v1807_v42, %v4969_v1  ;;  %3645 = vmatpush3.msra.mxu1 %v3016_v54  ;;  %v2999_v42 = vld [vmem:[%s5319_s4 + $0xe8] sm:$0xff] }
 0x180   : > { %3611 = vmatprep.subr.mxu0 %v2999_v42  ;;  %3646 = vmatprep.subr.mxu1 %v3031_v33  ;;  %v3003_v54 = vld [vmem:[%s5319_s4 + $0x108] sm:$0xff]  ;;  %v2986_v42 = vld [vmem:[%s5319_s4 + $0x80] sm:$0xff] }
 0x181   : > { %v3018_v33 = vld [vmem:[%s5319_s4 + $0x180] sm:$0xff] }
 0x18f   : > { %v2008_v49 = vpop.f32.mrf.mxu0 }
 0x190   : > { %v2051_v13 = vpop.f32.mrf.mxu1  ;;  %v2060_v40 = vadd.f32 %v2008_v49, %v1810_v28  ;;  %v2983_v49 = vld [vmem:[%s5319_s4 + $0x68] sm:$0xff] }
 0x191   : > { %v2062_v26 = vadd.f32 %v2051_v13, %v1812_v35  ;;  %v2010_v39 = vpop.f32.mrf.mxu0  ;;  %v3015_v13 = vld [vmem:[%s5319_s4 + $0x168] sm:$0xff]  ;;  %3612 = vmatpush3.msra.mxu0 %v2983_v49  ;;  %v2970_v49 = vld [vmem:[%s5319_s4] sm:$0xff] }
 0x192   : > { %v2053_v47 = vpop.f32.mrf.mxu1  ;;  %v2090_v48 = vmul.f32 %v4994_v52, %v2060_v40  ;;  %v2061_v56 = vadd.f32 %v2010_v39, %v1811_v9  ;;  %3647 = vmatpush3.msra.mxu1 %v3015_v13  ;;  %v2998_v40 = vld [vmem:[%s5319_s4 + $0xe0] sm:$0xff] }
 0x193   : > { %v2092_v55 = vmul.f32 %v4999_v43, %v2062_v26  ;;  %v2063_v57 = vadd.f32 %v2053_v47, %v1813_v6  ;;  %v2012_v36 = vpop.f32.mrf.mxu0  ;;  %v3030_v26 = vld [vmem:[%s5319_s4 + $0x1e0] sm:$0xff]  ;;  %3613 = vmatprep.subr.mxu0 %v2998_v40  ;;  %v5416_v40 = vmov 0.0  }
 0x194   : > { %v2055_v58 = vpop.f32.mrf.mxu1  ;;  %v2091_v59 = vmul.f32 %v5001_v50, %v2061_v56  ;;  %v2064_v2 = vadd.f32 %v2012_v36, %v1814_v25  ;;  %v2120_v12 = vadd.f32 %v5005_v41, %v2090_v48  ;;  %3648 = vmatprep.subr.mxu1 %v3030_v26  ;;  %v2982_v39 = vld [vmem:[%s5319_s4 + $0x60] sm:$0xff]  ;;  %v2997_v48 = vld [vmem:[%s5319_s4 + $0xd8] sm:$0xff]  ;;  %v2996_v36 = vld [vmem:[%s5319_s4 + $0xd0] sm:$0xff] }
 0x195   : > { %v2093_v61 = vmul.f32 %v5003_v44, %v2063_v57  ;;  %v2066_v7 = vadd.f32 %v2055_v58, %v1816_v27  ;;  %v2014_v8 = vpop.f32.mrf.mxu0  ;;  %v2122_v15 = vadd.f32 %v5007_v46, %v2092_v55  ;;  %v3014_v47 = vld [vmem:[%s5319_s4 + $0x160] sm:$0xff]  ;;  %3614 = vmatpush3.msra.mxu0 %v2982_v39  ;;  %v3029_v55 = vld [vmem:[%s5319_s4 + $0x1d8] sm:$0xff]  ;;  %v3028_v58 = vld [vmem:[%s5319_s4 + $0x1d0] sm:$0xff] }
 0x196   : > { %v2057_v11 = vpop.f32.mrf.mxu1  ;;  %v2094_v16 = vmul.f32 %v4994_v52, %v2064_v2  ;;  %v2065_v21 = vadd.f32 %v2014_v8, %v1815_v53  ;;  %v2121_v22 = vadd.f32 %v5012_v60, %v2091_v59  ;;  %v2128_v34 = vmax.f32 %v2120_v12, 0.0  ;;  %3649 = vmatpush3.msra.mxu1 %v3014_v47  ;;  %3615 = vmatprep.subr.mxu0 %v2997_v48  ;;  %v2981_v56 = vld [vmem:[%s5319_s4 + $0x58] sm:$0xff]  ;;  %v2980_v59 = vld [vmem:[%s5319_s4 + $0x50] sm:$0xff]  ;;  %v2995_v53 = vld [vmem:[%s5319_s4 + $0xc8] sm:$0xff] }
 0x197   : > { %v2096_v20 = vmul.f32 %v4999_v43, %v2066_v7  ;;  %v2067_v24 = vadd.f32 %v2057_v11, %v1817_v14  ;;  %v2123_v63 = vadd.f32 %v5015_v62, %v2093_v61  ;;  %v2130_v29 = vmax.f32 %v2122_v15, 0.0  ;;  %3650 = vmatprep.subr.mxu1 %v3029_v55  ;;  %v3013_v57 = vld [vmem:[%s5319_s4 + $0x158] sm:$0xff]  ;;  %3616 = vmatpush3.msra.mxu0 %v2981_v56  ;;  %v3012_v61 = vld [vmem:[%s5319_s4 + $0x150] sm:$0xff]  ;;  %v3027_v14 = vld [vmem:[%s5319_s4 + $0x1c8] sm:$0xff] }
 0x198   : > { %v2124_v1 = vadd.f32 %v5005_v41, %v2094_v16  ;;  %v2095_v17 = vmul.f32 %v5001_v50, %v2065_v21  ;;  %v2129_v37 = vmax.f32 %v2121_v22, 0.0  ;;  %3651 = vmatpush3.msra.mxu1 %v3013_v57  ;;  %3617 = vmatprep.subr.mxu0 %v2996_v36  ;;  %v2979_v2 = vld [vmem:[%s5319_s4 + $0x48] sm:$0xff]  ;;  %v2994_v8 = vld [vmem:[%s5319_s4 + $0xc0] sm:$0xff]  ;;  %v2993_v16 = vld [vmem:[%s5319_s4 + $0xb8] sm:$0xff] }
 0x199   : > { %v2126_v23 = vadd.f32 %v5007_v46, %v2096_v20  ;;  %v2097_v30 = vmul.f32 %v5003_v44, %v2067_v24  ;;  %v2131_v19 = vmax.f32 %v2123_v63, 0.0  ;;  %3652 = vmatprep.subr.mxu1 %v3028_v58  ;;  %3618 = vmatpush3.msra.mxu0 %v2980_v59  ;;  %v3011_v7 = vld [vmem:[%s5319_s4 + $0x148] sm:$0xff]  ;;  %v3026_v11 = vld [vmem:[%s5319_s4 + $0x1c0] sm:$0xff]  ;;  %v3025_v20 = vld [vmem:[%s5319_s4 + $0x1b8] sm:$0xff] }
 0x19a   : > { %v2132_v45 = vmax.f32 %v2124_v1, 0.0  ;;  %v2125_v28 = vadd.f32 %v5012_v60, %v2095_v17  ;;  %3653 = vmatpush3.msra.mxu1 %v3012_v61  ;;  %3619 = vmatprep.subr.mxu0 %v2995_v53  ;;  %v2978_v12 = vld [vmem:[%s5319_s4 + $0x40] sm:$0xff]  ;;  %v2977_v21 = vld [vmem:[%s5319_s4 + $0x38] sm:$0xff]  ;;  %v2992_v22 = vld [vmem:[%s5319_s4 + $0xb0] sm:$0xff] }
 0x19b   : > { %v2134_v18 = vmax.f32 %v2126_v23, 0.0  ;;  %v2127_v35 = vadd.f32 %v5015_v62, %v2097_v30  ;;  %3654 = vmatprep.subr.mxu1 %v3027_v14  ;;  %3620 = vmatpush3.msra.mxu0 %v2979_v2  ;;  %v3010_v15 = vld [vmem:[%s5319_s4 + $0x140] sm:$0xff]  ;;  %v3009_v24 = vld [vmem:[%s5319_s4 + $0x138] sm:$0xff]  ;;  %v3024_v63 = vld [vmem:[%s5319_s4 + $0x1b0] sm:$0xff] }
 0x19c   : > { %v5031_v9 = vadd.f32 %v2132_v45, %v2128_v34  ;;  %v2133_v10 = vmax.f32 %v2125_v28, 0.0  ;;  %3655 = vmatpush3.msra.mxu1 %v3011_v7  ;;  %3621 = vmatprep.subr.mxu0 %v2994_v8  ;;  %v2976_v1 = vld [vmem:[%s5319_s4 + $0x30] sm:$0xff]  ;;  %v2991_v17 = vld [vmem:[%s5319_s4 + $0xa8] sm:$0xff]  ;;  %v2990_v45 = vld [vmem:[%s5319_s4 + $0xa0] sm:$0xff] }
 0x19d   : > { %v5033_v6 = vadd.f32 %v2134_v18, %v2130_v29  ;;  %v2135_v51 = vmax.f32 %v2127_v35, 0.0  ;;  %3656 = vmatprep.subr.mxu1 %v3026_v11  ;;  %3622 = vmatpush3.msra.mxu0 %v2978_v12  ;;  %v3008_v23 = vld [vmem:[%s5319_s4 + $0x130] sm:$0xff]  ;;  %v3023_v30 = vld [vmem:[%s5319_s4 + $0x1a8] sm:$0xff]  ;;  %v3022_v18 = vld [vmem:[%s5319_s4 + $0x1a0] sm:$0xff] }
 0x19e   : > { %5632 = vst [vmem:[#allocation16_spill] sm:$0xff] %v5031_v9  ;;  %v5035_v25 = vadd.f32 %v2133_v10, %v2129_v37  ;;  %3657 = vmatpush3.msra.mxu1 %v3010_v15  ;;  %3623 = vmatprep.subr.mxu0 %v2993_v16  ;;  %v2975_v34 = vld [vmem:[%s5319_s4 + $0x28] sm:$0xff]  ;;  %v2974_v28 = vld [vmem:[%s5319_s4 + $0x20] sm:$0xff]  ;;  %v2989_v37 = vld [vmem:[%s5319_s4 + $0x98] sm:$0xff] }
 0x19f   : > { %5633 = vst [vmem:[#allocation17_spill] sm:$0xff] %v5033_v6  ;;  %v5037_v27 = vadd.f32 %v2135_v51, %v2131_v19  ;;  %3658 = vmatprep.subr.mxu1 %v3025_v20  ;;  %3624 = vmatpush3.msra.mxu0 %v2977_v21  ;;  %v3007_v29 = vld [vmem:[%s5319_s4 + $0x128] sm:$0xff]  ;;  %v3006_v35 = vld [vmem:[%s5319_s4 + $0x120] sm:$0xff]  ;;  %v3021_v19 = vld [vmem:[%s5319_s4 + $0x198] sm:$0xff] }
 0x1a0   : > { %5634 = vst [vmem:[#allocation18_spill] sm:$0xff] %v5035_v25  ;;  %3659 = vmatpush3.msra.mxu1 %v3009_v24  ;;  %3625 = vmatprep.subr.mxu0 %v2992_v22  ;;  %v2973_v10 = vld [vmem:[%s5319_s4 + $0x18] sm:$0xff]  ;;  %v3002_v13 = vld [vmem:[%s5319_s4 + $0x100] sm:$0xff] }
 0x1a1   : > { %5635 = vst [vmem:[#allocation19_spill] sm:$0xff] %v5037_v27  ;;  %3660 = vmatprep.subr.mxu1 %v3024_v63  ;;  %3626 = vmatpush3.msra.mxu0 %v2976_v1  ;;  %v3005_v51 = vld [vmem:[%s5319_s4 + $0x118] sm:$0xff] }
 0x1a2   : > { %3661 = vmatpush3.msra.mxu1 %v3008_v23  ;;  %3627 = vmatprep.subr.mxu0 %v2991_v17 }
 0x1a3   : > { %3662 = vmatprep.subr.mxu1 %v3023_v30  ;;  %3628 = vmatpush3.msra.mxu0 %v2975_v34 }
 0x1a4   : > { %3663 = vmatpush3.msra.mxu1 %v3007_v29  ;;  %3629 = vmatprep.subr.mxu0 %v2990_v45 }
 0x1a5   : > { %3664 = vmatprep.subr.mxu1 %v3022_v18  ;;  %3630 = vmatpush3.msra.mxu0 %v2974_v28 }
 0x1a6   : > { %3665 = vmatpush3.msra.mxu1 %v3006_v35  ;;  %3631 = vmatprep.subr.mxu0 %v2989_v37 }
 0x1a7   : > { %3666 = vmatprep.subr.mxu1 %v3021_v19  ;;  %3632 = vmatpush3.msra.mxu0 %v2973_v10  ;;  %v2225_v26 = vpop.f32.mrf.mxu0 }
 0x1a8   : > { %3667 = vmatpush3.msra.mxu1 %v3005_v51  ;;  %3633 = vmatprep.subr.mxu0 %v2988_v38  ;;  %v2268_v39 = vpop.f32.mrf.mxu1 }
 0x1a9   : > { %3668 = vmatprep.subr.mxu1 %v3020_v31  ;;  %3634 = vmatpush3.msra.mxu0 %v2972_v32  ;;  %v2227_v47 = vpop.f32.mrf.mxu0 }
 0x1aa   : > { %3669 = vmatpush3.msra.mxu1 %v3004_v3  ;;  %3635 = vmatprep.subr.mxu0 %v2987_v4  ;;  %v2270_v48 = vpop.f32.mrf.mxu1 }
 0x1ab   : > { %3670 = vmatprep.subr.mxu1 %v3019_v0  ;;  %3636 = vmatpush3.msra.mxu0 %v2971_v5  ;;  %v2229_v55 = vpop.f32.mrf.mxu0 }
 0x1ac   : > { %3671 = vmatpush3.msra.mxu1 %v3003_v54  ;;  %3637 = vmatprep.subr.mxu0 %v2986_v42  ;;  %v2272_v56 = vpop.f32.mrf.mxu1 }
 0x1ad   : > { %3672 = vmatprep.subr.mxu1 %v3018_v33  ;;  %3638 = vmatpush3.msra.mxu0 %v2970_v49  ;;  %v2231_v57 = vpop.f32.mrf.mxu0 }
 0x1ae   : > { %3673 = vmatpush3.msra.mxu1 %v3002_v13  ;;  %3682 = vmatprep.subr.mxu0 %v5416_v40  ;;  %v2274_v36 = vpop.f32.mrf.mxu1 }
 0x1bf   : > { %v2313_v58 = vpop.f32.mrf.mxu0 }
 0x1c0   : > { %v2356_v59 = vpop.f32.mrf.mxu1  ;;  %v2314_v0 = vadd.f32 %v2313_v58, %v2225_v26 }
 0x1c1   : > { %v2315_v61 = vpop.f32.mrf.mxu0  ;;  %v2357_v5 = vadd.f32 %v2356_v59, %v2268_v39 }
 0x1c2   : > { %v2358_v53 = vpop.f32.mrf.mxu1  ;;  %v2316_v54 = vadd.f32 %v2315_v61, %v2227_v47 }
 0x1c3   : > { %v2317_v14 = vpop.f32.mrf.mxu0  ;;  %v2359_v42 = vadd.f32 %v2358_v53, %v2270_v48 }
 0x1c4   : > { %v2360_v2 = vpop.f32.mrf.mxu1  ;;  %v2318_v46 = vadd.f32 %v2317_v14, %v2229_v55 }
 0x1c5   : > { %v2319_v7 = vpop.f32.mrf.mxu0  ;;  %v2361_v41 = vadd.f32 %v2360_v2, %v2272_v56 }
 0x1c6   : > { %v2362_v8 = vpop.f32.mrf.mxu1  ;;  %v2320_v43 = vadd.f32 %v2319_v7, %v2231_v57 }
 0x1c7   : > { %v2363_v52 = vadd.f32 %v2362_v8, %v2274_v36 }
 0x1d7   : > { %v2409_v11 = vpop.f32.mrf.mxu0 }
 0x1d8   : > { %v2452_v12 = vpop.f32.mrf.mxu1  ;;  %v2461_v33 = vadd.f32 %v2409_v11, %v2314_v0 }
 0x1d9   : > { %v2411_v15 = vpop.f32.mrf.mxu0  ;;  %v2463_v49 = vadd.f32 %v2452_v12, %v2357_v5  ;;  %v5644_v5 = vld [vmem:[#allocation16_spill] sm:$0xff] }
 0x1da   : > { %v2454_v16 = vpop.f32.mrf.mxu1  ;;  %v2462_v62 = vadd.f32 %v2411_v15, %v2316_v54  ;;  %v2137_v54 = vrot.slane %v5644_v5, 4 }
 0x1db   : > { %v2413_v20 = vpop.f32.mrf.mxu0  ;;  %v2464_v60 = vadd.f32 %v2454_v16, %v2359_v42  ;;  %v5645_v42 = vld [vmem:[#allocation17_spill] sm:$0xff] }
 0x1dc   : > { %v2456_v21 = vpop.f32.mrf.mxu1  ;;  %v2465_v26 = vadd.f32 %v2413_v20, %v2318_v46 }
 0x1dd   : > { %v2415_v24 = vpop.f32.mrf.mxu0  ;;  %v2467_v39 = vadd.f32 %v2456_v21, %v2361_v41 }
 0x1de   : > { %v2458_v22 = vpop.f32.mrf.mxu1  ;;  %v2466_v11 = vadd.f32 %v2415_v24, %v2320_v43 }
 0x1df   : > { %v2468_v12 = vadd.f32 %v2458_v22, %v2363_v52 }
 0x1ef   : > { %v2527_v63 = vpop.f32.mrf.mxu0 }
 0x1f0   : > { %v2570_v1 = vpop.f32.mrf.mxu1  ;;  %v2579_v6 = vadd.f32 %v2527_v63, %v2461_v33  ;;  %v5638_v63 = vld [vmem:[#allocation10_spill] sm:$0xff]  ;;  %v2151_v33 = vrot.slane %v5645_v42, 4 }
 0x1f1   : > { %v2529_v23 = vpop.f32.mrf.mxu0  ;;  %v2581_v9 = vadd.f32 %v2570_v1, %v2463_v49  ;;  %v5646_v49 = vld [vmem:[#allocation14_spill] sm:$0xff] }
 0x1f2   : > { %v2572_v17 = vpop.f32.mrf.mxu1  ;;  %v2580_v27 = vadd.f32 %v2529_v23, %v2462_v62  ;;  %v5639_v23 = vld [vmem:[#allocation11_spill] sm:$0xff] }
 0x1f3   : > { %v2531_v30 = vpop.f32.mrf.mxu0  ;;  %v2582_v25 = vadd.f32 %v2572_v17, %v2464_v60 }
 0x1f4   : > { %v2574_v34 = vpop.f32.mrf.mxu1  ;;  %v2583_v15 = vadd.f32 %v2531_v30, %v2465_v26  ;;  %v5647_v26 = vld [vmem:[#allocation15_spill] sm:$0xff] }
 0x1f5   : > { %v2533_v29 = vpop.f32.mrf.mxu0  ;;  %v2585_v16 = vadd.f32 %v2574_v34, %v2467_v39 }
 0x1f6   : > { %v2576_v45 = vpop.f32.mrf.mxu1  ;;  %v2584_v57 = vadd.f32 %v2533_v29, %v2466_v11 }
 0x1f7   : > { %v2586_v36 = vadd.f32 %v2576_v45, %v2468_v12 }
 0x207   : > { %v2631_v18 = vpop.f32.mrf.mxu0 }
 0x208   : > { %v2674_v28 = vpop.f32.mrf.mxu1  ;;  %v2683_v44 = vadd.f32 %v2631_v18, %v2579_v6 }
 0x209   : > { %v2633_v35 = vpop.f32.mrf.mxu0  ;;  %v2685_v50 = vadd.f32 %v2674_v28, %v2581_v9 }
 0x20a   : > { %v2676_v37 = vpop.f32.mrf.mxu1  ;;  %v2684_v58 = vadd.f32 %v2633_v35, %v2580_v27  ;;  %v5636_v27 = vld [vmem:[#allocation8_spill] sm:$0xff]  ;;  %v5640_v35 = vld [vmem:[#allocation18_spill] sm:$0xff] }
 0x20b   : > { %v2635_v19 = vpop.f32.mrf.mxu0  ;;  %v2686_v59 = vadd.f32 %v2676_v37, %v2582_v25  ;;  %v2144_v37 = vrot.slane %v5640_v35, 4 }
 0x20c   : > { %v2678_v10 = vpop.f32.mrf.mxu1  ;;  %v2687_v46 = vadd.f32 %v2635_v19, %v2583_v15  ;;  %v5641_v19 = vld [vmem:[#allocation19_spill] sm:$0xff] }
 0x20d   : > { %v2637_v51 = vpop.f32.mrf.mxu0  ;;  %v2689_v41 = vadd.f32 %v2678_v10, %v2585_v16  ;;  %v2158_v10 = vrot.slane %v5641_v19, 4 }
 0x20e   : > { %v2680_v38 = vpop.f32.mrf.mxu1  ;;  %v2688_v7 = vadd.f32 %v2637_v51, %v2584_v57  ;;  %v5642_v51 = vld [vmem:[#allocation12_spill] sm:$0xff] }
 0x20f   : > { %v2690_v8 = vadd.f32 %v2680_v38, %v2586_v36 }
 0x21f   : > { %v2749_v31 = vpop.f32.mrf.mxu0 }
 0x220   : > { %v2792_v32 = vpop.f32.mrf.mxu1  ;;  %v2801_v61 = vadd.f32 %v2749_v31, %v2683_v44  ;;  %v5637_v44 = vld [vmem:[#allocation9_spill] sm:$0xff] }
 0x221   : > { %v2751_v3 = vpop.f32.mrf.mxu0  ;;  %v2803_v53 = vadd.f32 %v2792_v32, %v2685_v50  ;;  %v5643_v31 = vld [vmem:[#allocation13_spill] sm:$0xff] }
 0x222   : > { %v2794_v4 = vpop.f32.mrf.mxu1  ;;  %v2802_v62 = vadd.f32 %v2751_v3, %v2684_v58 }
 0x223   : > { %v2753_v13 = vpop.f32.mrf.mxu0  ;;  %v2804_v60 = vadd.f32 %v2794_v4, %v2686_v59 }
 0x224   : > { %v2796_v40 = vpop.f32.mrf.mxu1  ;;  %v2805_v20 = vadd.f32 %v2753_v13, %v2687_v46 }
 0x225   : > { %v2755_v47 = vpop.f32.mrf.mxu0  ;;  %v2807_v21 = vadd.f32 %v2796_v40, %v2689_v41 }
 0x226   : > { %v2798_v48 = vpop.f32.mrf.mxu1  ;;  %v2806_v30 = vadd.f32 %v2755_v47, %v2688_v7 }
 0x227   : > { %v2808_v34 = vadd.f32 %v2798_v48, %v2690_v8 }
 0x237   : > { %v2853_v55 = vpop.f32.mrf.mxu0 }
 0x238   : > { %v2896_v56 = vpop.f32.mrf.mxu1  ;;  %v2905_v6 = vadd.f32 %v2853_v55, %v2801_v61  ;;  %v2145_v61 = vadd.f32 %v2144_v37, %v5640_v35 }
 0x239   : > { %v2907_v9 = vadd.f32 %v2896_v56, %v2803_v53  ;;  %v2855_v14 = vpop.f32.mrf.mxu0  ;;  %v2159_v53 = vadd.f32 %v2158_v10, %v5641_v19 }
 0x23a   : > { %v2898_v2 = vpop.f32.mrf.mxu1  ;;  %v2913_v25 = vmul.f32 %v2905_v6, %v5636_v27  ;;  %v2906_v43 = vadd.f32 %v2855_v14, %v2802_v62  ;;  %v2138_v62 = vadd.f32 %v2137_v54, %v5644_v5  ;;  %v2146_v14 = vrot.slane %v2145_v61, 2 }
 0x23b   : > { %v2915_v50 = vmul.f32 %v2907_v9, %v5637_v44  ;;  %v2908_v52 = vadd.f32 %v2898_v2, %v2804_v60  ;;  %v2857_v24 = vpop.f32.mrf.mxu0  ;;  %v2152_v60 = vadd.f32 %v2151_v33, %v5645_v42  ;;  %v2160_v2 = vrot.slane %v2159_v53, 2 }
 0x23c   : > { %v2900_v22 = vpop.f32.mrf.mxu1  ;;  %v2914_v1 = vmul.f32 %v2906_v43, %v5638_v63  ;;  %v2909_v29 = vadd.f32 %v2857_v24, %v2805_v20  ;;  %v2921_v38 = vadd.f32 %v2913_v25, %v5642_v51  ;;  %v2139_v43 = vrot.slane %v2138_v62, 2 }
 0x23d   : > { %v2916_v17 = vmul.f32 %v2908_v52, %v5639_v23  ;;  %v2911_v45 = vadd.f32 %v2900_v22, %v2807_v21  ;;  %v2859_v18 = vpop.f32.mrf.mxu0  ;;  %v2923_v40 = vadd.f32 %v2915_v50, %v5643_v31  ;;  %v2153_v52 = vrot.slane %v2152_v60, 2 }
 0x23e   : > { %v2902_v28 = vpop.f32.mrf.mxu1  ;;  %v2917_v32 = vmul.f32 %v2909_v29, %v5636_v27  ;;  %v2910_v4 = vadd.f32 %v2859_v18, %v2806_v30  ;;  %v2922_v13 = vadd.f32 %v2914_v1, %v5646_v49  ;;  %v2929_v11 = vmax.f32 %v2921_v38, 0.0 }
 0x23f   : > { %v2919_v3 = vmul.f32 %v2911_v45, %v5637_v44  ;;  %v2912_v0 = vadd.f32 %v2902_v28, %v2808_v34  ;;  %v2924_v39 = vadd.f32 %v2916_v17, %v5647_v26  ;;  %v2931_v12 = vmax.f32 %v2923_v40, 0.0 }
 0x240   : > { %v2925_v47 = vadd.f32 %v2917_v32, %v5642_v51  ;;  %v2918_v58 = vmul.f32 %v2910_v4, %v5638_v63  ;;  %v2930_v6 = vmax.f32 %v2922_v13, 0.0  ;;  %v2147_v24 = vadd.f32 %v2146_v14, %v2145_v61  ;;  %v3176_v61 = vld [vmem:[%s5320_s5 + $0x10] sm:$0xff] }
 0x241   : > { %v2927_v48 = vadd.f32 %v2919_v3, %v5643_v31  ;;  %v2920_v59 = vmul.f32 %v2912_v0, %v5639_v23  ;;  %v2932_v9 = vmax.f32 %v2924_v39, 0.0  ;;  %v2161_v22 = vadd.f32 %v2160_v2, %v2159_v53  ;;  %v3175_v53 = vld [vmem:[%s5320_s5 + $0x8] sm:$0xff] }
 0x242   : > { %v2933_v15 = vmax.f32 %v2925_v47, 0.0  ;;  %v2926_v55 = vadd.f32 %v2918_v58, %v5646_v49  ;;  %v2140_v30 = vadd.f32 %v2139_v43, %v2138_v62  ;;  %v2154_v34 = vadd.f32 %v2153_v52, %v2152_v60  ;;  %v3177_v58 = vld [vmem:[%s5320_s5 + $0x18] sm:$0xff] }
 0x243   : > { %v2935_v16 = vmax.f32 %v2927_v48, 0.0  ;;  %v2928_v56 = vadd.f32 %v2920_v59, %v5647_v26  ;;  %v2148_v35 = vrot.slane %v2147_v24, 1  ;;  %v2162_v37 = vrot.slane %v2161_v22, 1 }
 0x244   : > { %v2937_v57 = vadd.f32 %v2933_v15, %v2929_v11  ;;  %v2934_v46 = vmax.f32 %v2926_v55, 0.0  ;;  %v2141_v31 = vrot.slane %v2140_v30, 1  ;;  %v2155_v40 = vrot.slane %v2154_v34, 1  ;;  %v3174_v11 = vld [vmem:[%s5320_s5] sm:$0xff] }
 0x245   : > { %v2951_v36 = vadd.f32 %v2935_v16, %v2931_v12  ;;  %v2936_v41 = vmax.f32 %v2928_v56, 0.0  ;;  %v2149_v4 = vadd.f32 %v2148_v35, %v2147_v24  ;;  %v2163_v42 = vadd.f32 %v2162_v37, %v2161_v22 }
 0x246   : > { %v2938_v27 = vrot.slane %v2937_v57, 4  ;;  %v2944_v44 = vadd.f32 %v2934_v46, %v2930_v6  ;;  %v2142_v49 = vadd.f32 %v2141_v31, %v2140_v30  ;;  %v2156_v13 = vadd.f32 %v2155_v40, %v2154_v34  ;;  %v3601_v6 = vld [vmem:[%s5321_s6] ss:$0 sm:$0xff] }
 0x247   : > { %v2952_v25 = vrot.slane %v2951_v36, 4  ;;  %v2958_v50 = vadd.f32 %v2936_v41, %v2932_v9  ;;  %v5648_v59 = vmov 0.0  }
 0x248   : > { %v2939_v7 = vadd.f32 %v2938_v27, %v2937_v57  ;;  %v2945_v20 = vrot.slane %v2944_v44, 4 }
 0x249   : > { %v2953_v8 = vadd.f32 %v2952_v25, %v2951_v36  ;;  %v2959_v21 = vrot.slane %v2958_v50, 4 }
 0x24a   : > { %v2940_v63 = vrot.slane %v2939_v7, 2  ;;  %v2946_v23 = vadd.f32 %v2945_v20, %v2944_v44 }
 0x24b   : > { %v2954_v1 = vrot.slane %v2953_v8, 2  ;;  %v2960_v17 = vadd.f32 %v2959_v21, %v2958_v50 }
 0x24c   : > { %v2947_v29 = vrot.slane %v2946_v23, 2  ;;  %v2941_v18 = vadd.f32 %v2940_v63, %v2939_v7 }
 0x24d   : > { %v2961_v45 = vrot.slane %v2960_v17, 2  ;;  %v2955_v28 = vadd.f32 %v2954_v1, %v2953_v8 }
 0x24e   : > { %v2948_v19 = vadd.f32 %v2947_v29, %v2946_v23  ;;  %v2942_v51 = vrot.slane %v2941_v18, 1 }
 0x24f   : > { %v2962_v10 = vadd.f32 %v2961_v45, %v2960_v17  ;;  %v2956_v38 = vrot.slane %v2955_v28, 1 }
 0x250   : > { %v2949_v32 = vrot.slane %v2948_v19, 1  ;;  %v2943_v0 = vadd.f32 %v2942_v51, %v2941_v18 }
 0x251   : > { %v2963_v3 = vrot.slane %v2962_v10, 1  ;;  %v2957_v5 = vadd.f32 %v2956_v38, %v2955_v28 }
 0x252   : > { %v2950_v54 = vadd.f32 %v2949_v32, %v2948_v19  ;;  %v2966_v47 = vsel %vm2965_vm8, %v2142_v49, %v2943_v0 }
 0x253   : > { %v2964_v33 = vadd.f32 %v2963_v3, %v2962_v10  ;;  %v2968_v48 = vsel %vm2965_vm8, %v2156_v13, %v2957_v5 }
 0x254   : > { %v2967_v26 = vsel %vm2965_vm8, %v2149_v4, %v2950_v54 }
 0x255   : > { %v2969_v39 = vsel %vm2965_vm8, %v2163_v42, %v2964_v33  ;;  %3098 = vmatprep.mubr.f32.mxu0 %v2967_v26 }
 0x256   : > { %3168 = vmatprep.mubr.f32.mxu1 %v2969_v39  ;;  %3099 = vmatmul.mubr.f32.vlgmr.msra.gmra.mxu0 %v2966_v47 }
 0x257   : > { %3169 = vmatmul.mubr.f32.vlgmr.msra.gmra.mxu1 %v2968_v48  ;;  %3683 = vmatpush3.msra.mxu0 %v3177_v58 }
 0x258   : > { %3684 = vmatprep.subr.mxu0 %v5648_v59  ;;  %3690 = vmatprep.mubr.msk.f32.mxu0 %vm4126_vm9, %v5648_v59 }
 0x259   : > { %3685 = vmatpush3.msra.mxu0 %v3176_v61 }
 0x25a   : > { %3686 = vmatprep.subr.mxu0 %v5648_v59 }
 0x25b   : > { %3687 = vmatpush3.msra.mxu0 %v3175_v53 }
 0x25c   : > { %3688 = vmatprep.subr.mxu0 %v5648_v59 }
 0x25d   : > { %3689 = vmatpush3.msra.mxu0 %v3174_v11 }
 0x316   : > { %v3639_v12 = vpop.f32.mrf.mxu0 }
 0x317   : > { %v3674_v15 = vpop.f32.mrf.mxu1 }
 0x318   : > { %v3640_v16 = vpop.f32.mrf.mxu0 }
 0x319   : > { %v3675_v55 = vpop.f32.mrf.mxu1  ;;  %v3641_v56 = vadd.f32 %v3640_v16, %v3639_v12 }
 0x31a   : > { %v3676_v62 = vadd.f32 %v3675_v55, %v3674_v15 }
 0x31c   : > { %v3171_v60 = vadd.f32 %v3676_v62, %v3641_v56 }
 0x31e   : > { %3691 = vmatmul.mubr.msk.f32.vlgmr.msra.gmra.mxu0 %vm3185_vm10, %v3171_v60 }
 0x3de   : > { %v3255_v9 = vpop.f32.mrf.mxu0 }
 0x3df   : > { %v3256_v57 = vadd.f32 %v3601_v6, %v3255_v9 }
 0x3e0   : > { %v3692_v36 = vpop.f32.mrf.mxu0 }
 0x3e1   : > { %3260 = vst.msk [vmem:[%s289_s17] sm:$0x3] %vm3259_vm11, %v3256_v57 }
 0x3e2   : > { %4068 = shalt.err (!%p4065_p0)
}
 0x3e3   : > { %s4069_s13 = scalar_lea.hbm %s5280_s21, 32  ;;  %s4073_s15 = scalar_lea.hbm %s5322_s7, 64 }
 0x3e4   : > { %p4070_p1 = scmp.ne.s32.totalorder %s5280_s21, %s4069_s13  ;;  %p4074_p4 = scmp.lt.s32.totalorder %s5280_s21, %s5322_s7 }
 0x3e5   : > { %p4075_p7 = scmp.lt.s32.totalorder %s4073_s15, %s4069_s13 }
 0x3e6   : > { %p4071_p2 = pnand %p4070_p1, %p4206_p5 }
 0x3e7   : > { %p4076_p6 = por %p4075_p7, %p4074_p4 }
 0x3e8   : > { %p4072_p3 = pneg %p4071_p2 }
 0x3ea   : > { %p4077_p8 = pnand %p4076_p6, %p4072_p3 }
 0x3ec   : > { %4080 = shalt.err (!%p4077_p8)
}
 0x3ed   : > { %3698 = dma.vmem_to_hbm [thread:$0]  (%p4206_p5), %s3276_s18, 32, %s5280_s21, %s3262_s22  }
 0x3ee PF: > { %p3710_p9 = scmp.ge.s32.totalorder %s4119_s27, 2  ;;  %s3287_s19 = sand.u32 1, %s4107_s24  }
 0x3ef   : > { %p5649_p10 = scmp.ne.s32.totalorder %s5439_s12, 0  ;;  %s3288_s20 = scalar_lea.sflag [#allocation4], %s3287_s19 }
 0x3f1   : > { %p3705_p11 = pnand %p3710_p9, %p5649_p10 }
 0x3f3   : > { %p3706_p12 = pneg %p3705_p11 }
 0x3f5   : > { %4102 = dma.done.wait (%p3706_p12), %s3288_s20, 32  }
 0x3f6   : > { %4104 = vsyncadd (%p3706_p12), %s3288_s20, 4294967264  ;;  %p18_p13 = scmp.ge.s32.totalorder %s4193_s30, 4   ;;  %s5650_s24 = smov %s4111_s25 }
 0x3f7   : > { %s5651_s25 = smov %s4115_s26  ;;  %s5652_s26 = smov %s4204_s10 }
 0x3f8   : > { %s5653_s27 = smov %s4193_s30  ;;  %20 = sbr.rel (!%p18_p13) target bundleno = 4 (0x4), region = 95 }
 0x3fd   :  { %3293 = vsyncpa [#allocation3], 1 }
 0x3fe   :  { %3295 = vsyncpa [#allocation3 + $0x1], 1 }
 0x3ff   :  { %3296 = vsyncpa [#allocation4], 1 }
 0x400   :  { %3298 = vsyncpa [#allocation4 + $0x1], 1 }

</bundles_post_ra>
